<compile_context>
chip_gen: v7x
topology: tpu7x:2x2x1
jax: 0.10.0
libtpu: 0.0.40
codegen_flags: <defaults>
</compile_context>

<pallas_src>
import functools

import jax
import jax.numpy as jnp
from jax import lax
from jax.experimental import pallas as pl
from jax.experimental.pallas import tpu as pltpu


# --------------------------------------------------------------------------
# Kernel
# --------------------------------------------------------------------------
def make_conv_lstm_cell_kernel(Ch, Cc, S, HW):
    """S = samples packed into one grid step (lane dim = S*HW)."""
    SL = S * HW

    def kernel(rhs_ref, w_ref, c_ref, h_out_ref, c_out_ref, pre_ref):
        # ONE fused bf16 MXU matmul: conv_cc (o,i,f,g) + bias (constant-1 row)
        # + peephole conv_ll columns, f32 accumulation.  Land it in a VMEM
        # scratch so no huge live accumulator / register spills.
        pre_ref[...] = jnp.dot(w_ref[...], rhs_ref[...],
                               preferred_element_type=jnp.float32)

        # Fused weight row layout: [o (Ch) | i (Cc) | f (Cc) | g (Cc)].
        o_g = jax.nn.sigmoid(pre_ref[0:Ch, :])
        i_g = jax.nn.sigmoid(pre_ref[Ch:Ch + Cc, :])
        f_g = jax.nn.sigmoid(pre_ref[Ch + Cc:Ch + 2 * Cc, :])
        g = jnp.tanh(pre_ref[Ch + 2 * Cc:Ch + 3 * Cc, :])

        c_next = f_g * c_ref[...] + i_g * g                      # (Cc, SL) f32
        tanh_c = jnp.tanh(c_next)
        if Ch == Cc:
            h_next = o_g * tanh_c
        else:  # Cc == 1: torch `.repeat([1, Ch, 1, 1])` == channel broadcast
            h_next = o_g * jnp.broadcast_to(tanh_c, (Ch, SL))

        # Static unroll over the S samples in this block; each store is a
        # lane-dense, 128-aligned (C, HW) slab.
        for s in range(S):
            sl = slice(s * HW, (s + 1) * HW)
            c_out_ref[s] = c_next[:, sl].astype(c_out_ref.dtype)
            h_out_ref[s] = h_next[:, sl].astype(h_out_ref.dtype)

    return kernel


# --------------------------------------------------------------------------
# Wrapper glue (XLA): concat, InstanceNorm, reflect pad, im2col, weight fusion
# --------------------------------------------------------------------------
def _build_im2col(x_nchw, ksize, dil, H, W):
    """(N, C, H, W) f32 -> (k*k*C, N*H*W) slab, tap-major / channel-minor,
    lanes ordered batch-major (sample0's HW positions, then sample1's, ...)."""
    N, C = x_nchw.shape[0], x_nchw.shape[1]
    pad = dil * (ksize - 1) // 2
    xp = x_nchw
    if pad > 0:
        assert pad < H and pad < W, "reflect pad exceeds spatial extent"
        xp = jnp.pad(xp, ((0, 0), (0, 0), (pad, pad), (pad, pad)), mode="reflect")
    xp = jnp.transpose(xp, (1, 0, 2, 3))                  # (C, N, Hp, Wp)
    taps = []
    for dy in range(ksize):
        for dx in range(ksize):
            taps.append(xp[:, :, dy * dil:dy * dil + H,
                           dx * dil:dx * dil + W].reshape(C, N * H * W))
    return jnp.concatenate(taps, axis=0)


def _default_samples_per_block(n):
    """2-TensorCore chips (v7x, v4/v5p megacore): 1 sample per grid step so the
    'parallel' grid axis shards across cores.  Single-TC chips (v5e/v6e): pack
    all samples into one grid step (wider MXU lane dim, one step overhead)."""
    try:
        kind = jax.devices()[0].device_kind.lower()
    except Exception:
        return n
    if any(tag in kind for tag in ("v7", "7x", "v4", "v5p")):
        return 1
    return n


@functools.partial(jax.jit, static_argnames=("kernel_size", "memory_kernel_size",
                                              "dilation_rate", "layer_norm_flag",
                                              "peephole", "samples_per_block"))
def _conv_lstm_cell_pallas(x, h_cur, c_cur, params, *, kernel_size,
                           memory_kernel_size, dilation_rate, layer_norm_flag,
                           peephole, samples_per_block):
    N, Cx, H, W = x.shape
    Ch = h_cur.shape[1]
    Cc = c_cur.shape[1]
    Cin = Cx + Ch
    k, km, dil = kernel_size, memory_kernel_size, dilation_rate
    HW = H * W
    NHW = N * HW
    S = samples_per_block
    Cout = Ch + 3 * Cc
    f32, bf16 = jnp.float32, jnp.bfloat16

    assert k % 2 == 1 and km % 2 == 1, "'same' reflect padding assumes odd kernels"
    assert N % S == 0

    # ---- concat + (optional) InstanceNorm2d(affine=True), all in f32, once,
    #      on the un-replicated tensor (pre-im2col) ----
    combined = jnp.concatenate([x, h_cur], axis=1).astype(f32)       # (N, Cin, H, W)
    if layer_norm_flag:
        mean = jnp.mean(combined, axis=(2, 3), keepdims=True)
        var = jnp.mean(jnp.square(combined - mean), axis=(2, 3), keepdims=True)
        combined = (combined - mean) * lax.rsqrt(var + 1e-5)
        combined = (combined * params["gamma"][None, :, None, None]
                    + params["beta"][None, :, None, None])

    # ---- RHS: [im2col slab | constant-1 bias row | peephole c slab] ----
    slab = _build_im2col(combined, k, dil, H, W)                     # (k*k*Cin, NHW)
    rhs_parts = [slab, jnp.ones((1, NHW), f32)]

    # ---- fused weight, rows reordered to [o | i | f | g] ----
    K_cc = k * k * Cin
    w_cc2 = jnp.transpose(params["w_cc"], (0, 2, 3, 1)).reshape(Cout, K_cc).astype(f32)
    w_main = jnp.concatenate([w_cc2[3 * Cc:], w_cc2[:3 * Cc]], axis=0)
    b_cc = params["b_cc"].reshape(Cout, 1).astype(f32)
    b_col = jnp.concatenate([b_cc[3 * Cc:], b_cc[:3 * Cc]], axis=0)
    w_parts = [w_main, b_col]

    if peephole:
        K_ll = km * km * Cc
        cslab = _build_im2col(c_cur.astype(f32), km, dil, H, W)      # (K_ll, NHW)
        rhs_parts.append(cslab)
        Cout_ll = Ch + 2 * Cc
        w_ll2 = jnp.transpose(params["w_ll"], (0, 2, 3, 1)).reshape(Cout_ll, K_ll).astype(f32)
        # fused rows: o <- ll_o, i <- ll_i, f <- ll_f, g <- zeros
        w_peep = jnp.concatenate([w_ll2[2 * Cc:], w_ll2[:2 * Cc],
                                  jnp.zeros((Cc, K_ll), f32)], axis=0)
        w_parts.append(w_peep)

    rhs = jnp.concatenate(rhs_parts, axis=0)                         # (K_total, NHW)
    w_full = jnp.concatenate(w_parts, axis=1)                        # (Cout, K_total)
    K_total = rhs.shape[0]
    K_pad = ((K_total + 15) // 16) * 16                              # bf16 sublane packing
    if K_pad != K_total:
        rhs = jnp.pad(rhs, ((0, K_pad - K_total), (0, 0)))
        w_full = jnp.pad(w_full, ((0, 0), (0, K_pad - K_total)))
    rhs = rhs.astype(bf16)
    w_full = w_full.astype(bf16)

    # current cell state in the same (C, N*HW) lane layout as the matmul result
    c_flat = jnp.transpose(c_cur.reshape(N, Cc, HW), (1, 0, 2)).reshape(Cc, NHW).astype(f32)

    kernel = make_conv_lstm_cell_kernel(Ch, Cc, S, HW)

    h_flat, c_next_flat = pl.pallas_call(
        kernel,
        out_shape=(jax.ShapeDtypeStruct((N, Ch, HW), f32),
                   jax.ShapeDtypeStruct((N, Cc, HW), f32)),
        grid=(N // S,),
        in_specs=[
            pl.BlockSpec((K_pad, S * HW), lambda b: (0, b)),         # fused RHS
            pl.BlockSpec((Cout, K_pad), lambda b: (0, 0)),           # fused weight
            pl.BlockSpec((Cc, S * HW), lambda b: (0, b)),            # c_cur
        ],
        out_specs=(pl.BlockSpec((S, Ch, HW), lambda b: (b, 0, 0)),
                   pl.BlockSpec((S, Cc, HW), lambda b: (b, 0, 0))),
        scratch_shapes=[pltpu.VMEM((Cout, S * HW), jnp.float32)],    # dot result
        compiler_params=pltpu.CompilerParams(dimension_semantics=("parallel",)),
    )(rhs, w_full, c_flat)

    # NCHW restore is a free reshape (lanes already sample-major, HW-contiguous).
    return h_flat.reshape(N, Ch, H, W), c_next_flat.reshape(N, Cc, H, W)


def conv_lstm_cell_pallas(x, h_cur, c_cur, params, *, kernel_size,
                          memory_kernel_size, dilation_rate, layer_norm_flag,
                          peephole, samples_per_block=None):
    N = x.shape[0]
    if samples_per_block is None:
        samples_per_block = _default_samples_per_block(N)
    if N % samples_per_block != 0:
        samples_per_block = 1
    return _conv_lstm_cell_pallas(
        x, h_cur, c_cur, params, kernel_size=kernel_size,
        memory_kernel_size=memory_kernel_size, dilation_rate=dilation_rate,
        layer_norm_flag=layer_norm_flag, peephole=peephole,
        samples_per_block=samples_per_block)


# --------------------------------------------------------------------------
# Pure-JAX f32 reference matching the PyTorch forward (NCHW)
# --------------------------------------------------------------------------
def conv_lstm_cell_reference(x, h_cur, c_cur, params, *, kernel_size,
                             memory_kernel_size, dilation_rate,
                             layer_norm_flag, peephole):
    Cc = c_cur.shape[1]
    Ch = h_cur.shape[1]
    dil = dilation_rate
    combined = jnp.concatenate([x, h_cur], axis=1)
    if layer_norm_flag:
        mean = jnp.mean(combined, axis=(2, 3), keepdims=True)
        var = jnp.var(combined, axis=(2, 3), keepdims=True)
        combined = (combined - mean) / jnp.sqrt(var + 1e-5)
        combined = (combined * params["gamma"][None, :, None, None]
                    + params["beta"][None, :, None, None])

    def same_reflect_conv(inp, w, ksize):
        p = dil * (ksize - 1) // 2
        if p > 0:
            inp = jnp.pad(inp, ((0, 0), (0, 0), (p, p), (p, p)), mode="reflect")
        return lax.conv_general_dilated(
            inp, w, window_strides=(1, 1), padding="VALID",
            rhs_dilation=(dil, dil),
            dimension_numbers=("NCHW", "OIHW", "NCHW"),
            precision=lax.Precision.HIGHEST)

    conv = same_reflect_conv(combined, params["w_cc"], kernel_size)
    conv = conv + params["b_cc"][None, :, None, None]
    cc_i = conv[:, 0:Cc]
    cc_f = conv[:, Cc:2 * Cc]
    cc_g = conv[:, 2 * Cc:3 * Cc]
    cc_o = conv[:, 3 * Cc:3 * Cc + Ch]
    if peephole:
        mem = same_reflect_conv(c_cur, params["w_ll"], memory_kernel_size)
        ll_i, ll_f, ll_o = mem[:, 0:Cc], mem[:, Cc:2 * Cc], mem[:, 2 * Cc:2 * Cc + Ch]
        i = jax.nn.sigmoid(cc_i + ll_i)
        f = jax.nn.sigmoid(cc_f + ll_f)
        o = jax.nn.sigmoid(cc_o + ll_o)
    else:
        i = jax.nn.sigmoid(cc_i)
        f = jax.nn.sigmoid(cc_f)
        o = jax.nn.sigmoid(cc_o)
    g = jnp.tanh(cc_g)
    c_next = f * c_cur + i * g
    if Ch == Cc:
        h_next = o * jnp.tanh(c_next)
    else:  # c_channels == 1
        h_next = o * jnp.tile(jnp.tanh(c_next), (1, Ch, 1, 1))
    return h_next, c_next


# --------------------------------------------------------------------------
if __name__ == "__main__":
    B, Cx, H, W = 2, 4, 16, 16
    Ch = 32
    k, km, dil = 3, 3, 1

    configs = [
        dict(big_mem=True, layer_norm_flag=True, peephole=True),
        dict(big_mem=False, layer_norm_flag=False, peephole=False),
    ]

    key = jax.random.PRNGKey(0)
    for cfg in configs:
        Cc = Ch if cfg["big_mem"] else 1
        Cin = Cx + Ch
        Cout_cc = Ch + 3 * Cc
        Cout_ll = Ch + 2 * Cc

        keys = jax.random.split(key, 8)
        x = jax.random.normal(keys[0], (B, Cx, H, W), jnp.float32)
        h_cur = jax.random.normal(keys[1], (B, Ch, H, W), jnp.float32)
        c_cur = jax.random.normal(keys[2], (B, Cc, H, W), jnp.float32)

        params = dict(
            w_cc=jax.random.normal(keys[3], (Cout_cc, Cin, k, k), jnp.float32)
            / jnp.sqrt(float(Cin * k * k)),
            b_cc=0.1 * jax.random.normal(keys[4], (Cout_cc,), jnp.float32),
            w_ll=jax.random.normal(keys[5], (Cout_ll, Cc, km, km), jnp.float32)
            / jnp.sqrt(float(max(Cc * km * km, 1))),
            gamma=1.0 + 0.1 * jax.random.normal(keys[6], (Cin,), jnp.float32),
            beta=0.1 * jax.random.normal(keys[7], (Cin,), jnp.float32),
        )

        kwargs = dict(kernel_size=k, memory_kernel_size=km, dilation_rate=dil,
                      layer_norm_flag=cfg["layer_norm_flag"],
                      peephole=cfg["peephole"])

        h_next, c_next = conv_lstm_cell_pallas(x, h_cur, c_cur, params, **kwargs)
        jax.block_until_ready((h_next, c_next))

        h_ref, c_ref = conv_lstm_cell_reference(x, h_cur, c_cur, params, **kwargs)
        assert h_next.shape == h_ref.shape and c_next.shape == c_ref.shape
        # bf16 MXU operands (f32 accumulation) vs f32 HIGHEST reference -> 1e-2 tol.
        assert jnp.allclose(h_next, h_ref, atol=1e-2, rtol=1e-2), (
            f"h mismatch: {jnp.max(jnp.abs(h_next - h_ref))}")
        assert jnp.allclose(c_next, c_ref, atol=1e-2, rtol=1e-2), (
            f"c mismatch: {jnp.max(jnp.abs(c_next - c_ref))}")

    print("KERNEL_OK")
</pallas_src>

<mosaic_0001>
module attributes {stable_mosaic.version = 11 : i64} {
  func.func @kernel(%arg0: i32, %arg1: memref<624x512xbf16, #tpu.memory_space<vmem>>, %arg2: memref<128x624xbf16, #tpu.memory_space<vmem>>, %arg3: memref<32x512xf32, #tpu.memory_space<vmem>>, %arg4: memref<2x32x256xf32, #tpu.memory_space<vmem>>, %arg5: memref<2x32x256xf32, #tpu.memory_space<vmem>>, %arg6: memref<128x512xf32, #tpu.memory_space<vmem>>) attributes {dimension_semantics = [#tpu.dimension_semantics<parallel>], iteration_bounds = array<i64: 1>, scalar_prefetch = 0 : i64, scratch_operands = 1 : i64, tpu.core_type = #tpu.core_type<tc>, window_params = [{transform_indices = @transform_0, window_bounds = array<i64: 624, 512>}, {pipeline_mode = #tpu.pipeline_mode<synchronous>, transform_indices = @transform_1, window_bounds = array<i64: 128, 624>}, {transform_indices = @transform_2, window_bounds = array<i64: 32, 512>}, {transform_indices = @transform_3, window_bounds = array<i64: 2, 32, 256>}, {transform_indices = @transform_4, window_bounds = array<i64: 2, 32, 256>}]} {
    %c0 = arith.constant 0 : index
    %c0_0 = arith.constant 0 : index
    %0 = vector.load %arg2[%c0, %c0_0] : memref<128x624xbf16, #tpu.memory_space<vmem>>, vector<128x624xbf16>
    %c0_1 = arith.constant 0 : index
    %c0_2 = arith.constant 0 : index
    %1 = vector.load %arg1[%c0_1, %c0_2] : memref<624x512xbf16, #tpu.memory_space<vmem>>, vector<624x512xbf16>
    %cst = arith.constant dense<0.000000e+00> : vector<128x512xf32>
    %2 = tpu.matmul %0, %1, %cst {dimension_numbers = #tpu.dot_dimension_numbers<[1], [0], [0], [1], [0, 0, 1, 1], [], []>} : vector<128x624xbf16>, vector<624x512xbf16>, vector<128x512xf32> -> vector<128x512xf32>
    %c0_3 = arith.constant 0 : index
    %c0_4 = arith.constant 0 : index
    %3 = vector.load %arg6[%c0_3, %c0_4] : memref<128x512xf32, #tpu.memory_space<vmem>>, vector<128x512xf32>
    tpu.vector_store %arg6[%c0_3, %c0_4], %2 {strides = array<i32>} : memref<128x512xf32, #tpu.memory_space<vmem>>, vector<128x512xf32>,
    %c0_5 = arith.constant 0 : index
    %c0_6 = arith.constant 0 : index
    %4 = vector.load %arg6[%c0_5, %c0_6] : memref<128x512xf32, #tpu.memory_space<vmem>>, vector<32x512xf32>
    %5 = arith.negf %4 : vector<32x512xf32>
    %6 = math.exp %5 : vector<32x512xf32>
    %cst_7 = arith.constant 1.000000e+00 : f32
    %7 = vector.broadcast %cst_7 : f32 to vector<32x512xf32>
    %8 = arith.addf %7, %6 : vector<32x512xf32>
    %9 = arith.divf %7, %8 : vector<32x512xf32>
    %c32 = arith.constant 32 : index
    %c0_8 = arith.constant 0 : index
    %10 = vector.load %arg6[%c32, %c0_8] : memref<128x512xf32, #tpu.memory_space<vmem>>, vector<32x512xf32>
    %11 = arith.negf %10 : vector<32x512xf32>
    %12 = math.exp %11 : vector<32x512xf32>
    %cst_9 = arith.constant 1.000000e+00 : f32
    %13 = vector.broadcast %cst_9 : f32 to vector<32x512xf32>
    %14 = arith.addf %13, %12 : vector<32x512xf32>
    %15 = arith.divf %13, %14 : vector<32x512xf32>
    %c64 = arith.constant 64 : index
    %c0_10 = arith.constant 0 : index
    %16 = vector.load %arg6[%c64, %c0_10] : memref<128x512xf32, #tpu.memory_space<vmem>>, vector<32x512xf32>
    %17 = arith.negf %16 : vector<32x512xf32>
    %18 = math.exp %17 : vector<32x512xf32>
    %cst_11 = arith.constant 1.000000e+00 : f32
    %19 = vector.broadcast %cst_11 : f32 to vector<32x512xf32>
    %20 = arith.addf %19, %18 : vector<32x512xf32>
    %21 = arith.divf %19, %20 : vector<32x512xf32>
    %c96 = arith.constant 96 : index
    %c0_12 = arith.constant 0 : index
    %22 = vector.load %arg6[%c96, %c0_12] : memref<128x512xf32, #tpu.memory_space<vmem>>, vector<32x512xf32>
    %23 = math.tanh %22 : vector<32x512xf32>
    %c0_13 = arith.constant 0 : index
    %c0_14 = arith.constant 0 : index
    %24 = vector.load %arg3[%c0_13, %c0_14] : memref<32x512xf32, #tpu.memory_space<vmem>>, vector<32x512xf32>
    %25 = arith.mulf %21, %24 : vector<32x512xf32>
    %26 = arith.mulf %15, %23 : vector<32x512xf32>
    %27 = arith.addf %25, %26 : vector<32x512xf32>
    %28 = math.tanh %27 : vector<32x512xf32>
    %29 = arith.mulf %9, %28 : vector<32x512xf32>
    %30 = vector.extract_strided_slice %27 {offsets = [0, 0], sizes = [32, 256], strides = [1, 1]} : vector<32x512xf32> to vector<32x256xf32>
    %c0_15 = arith.constant 0 : index
    %c0_16 = arith.constant 0 : index
    %c0_17 = arith.constant 0 : index
    %31 = vector.load %arg5[%c0_15, %c0_16, %c0_17] : memref<2x32x256xf32, #tpu.memory_space<vmem>>, vector<1x32x256xf32>
    %32 = vector.shape_cast %31 : vector<1x32x256xf32> to vector<32x256xf32>
    %33 = vector.shape_cast %30 : vector<32x256xf32> to vector<1x32x256xf32>
    tpu.vector_store %arg5[%c0_15, %c0_16, %c0_17], %33 {strides = array<i32>} : memref<2x32x256xf32, #tpu.memory_space<vmem>>, vector<1x32x256xf32>,
    %34 = vector.extract_strided_slice %29 {offsets = [0, 0], sizes = [32, 256], strides = [1, 1]} : vector<32x512xf32> to vector<32x256xf32>
    %c0_18 = arith.constant 0 : index
    %c0_19 = arith.constant 0 : index
    %c0_20 = arith.constant 0 : index
    %35 = vector.load %arg4[%c0_18, %c0_19, %c0_20] : memref<2x32x256xf32, #tpu.memory_space<vmem>>, vector<1x32x256xf32>
    %36 = vector.shape_cast %35 : vector<1x32x256xf32> to vector<32x256xf32>
    %37 = vector.shape_cast %34 : vector<32x256xf32> to vector<1x32x256xf32>
    tpu.vector_store %arg4[%c0_18, %c0_19, %c0_20], %37 {strides = array<i32>} : memref<2x32x256xf32, #tpu.memory_space<vmem>>, vector<1x32x256xf32>,
    %38 = vector.extract_strided_slice %27 {offsets = [0, 256], sizes = [32, 256], strides = [1, 1]} : vector<32x512xf32> to vector<32x256xf32>
    %c1 = arith.constant 1 : index
    %c0_21 = arith.constant 0 : index
    %c0_22 = arith.constant 0 : index
    %39 = vector.load %arg5[%c1, %c0_21, %c0_22] : memref<2x32x256xf32, #tpu.memory_space<vmem>>, vector<1x32x256xf32>
    %40 = vector.shape_cast %39 : vector<1x32x256xf32> to vector<32x256xf32>
    %41 = vector.shape_cast %38 : vector<32x256xf32> to vector<1x32x256xf32>
    tpu.vector_store %arg5[%c1, %c0_21, %c0_22], %41 {strides = array<i32>} : memref<2x32x256xf32, #tpu.memory_space<vmem>>, vector<1x32x256xf32>,
    %42 = vector.extract_strided_slice %29 {offsets = [0, 256], sizes = [32, 256], strides = [1, 1]} : vector<32x512xf32> to vector<32x256xf32>
    %c1_23 = arith.constant 1 : index
    %c0_24 = arith.constant 0 : index
    %c0_25 = arith.constant 0 : index
    %43 = vector.load %arg4[%c1_23, %c0_24, %c0_25] : memref<2x32x256xf32, #tpu.memory_space<vmem>>, vector<1x32x256xf32>
    %44 = vector.shape_cast %43 : vector<1x32x256xf32> to vector<32x256xf32>
    %45 = vector.shape_cast %42 : vector<32x256xf32> to vector<1x32x256xf32>
    tpu.vector_store %arg4[%c1_23, %c0_24, %c0_25], %45 {strides = array<i32>} : memref<2x32x256xf32, #tpu.memory_space<vmem>>, vector<1x32x256xf32>,
    return
  }
  func.func @transform_0(%arg0: i32) -> (i32, i32) {
    %c0_i32 = arith.constant 0 : i32
    %c0_i32_0 = arith.constant 0 : i32
    return %c0_i32, %arg0 : i32, i32
  }
  func.func @transform_1(%arg0: i32) -> (i32, i32) {
    %c0_i32 = arith.constant 0 : i32
    %c0_i32_0 = arith.constant 0 : i32
    %c0_i32_1 = arith.constant 0 : i32
    return %c0_i32, %c0_i32_0 : i32, i32
  }
  func.func @transform_2(%arg0: i32) -> (i32, i32) {
    %c0_i32 = arith.constant 0 : i32
    %c0_i32_0 = arith.constant 0 : i32
    return %c0_i32, %arg0 : i32, i32
  }
  func.func @transform_3(%arg0: i32) -> (i32, i32, i32) {
    %c0_i32 = arith.constant 0 : i32
    %c0_i32_0 = arith.constant 0 : i32
    %c0_i32_1 = arith.constant 0 : i32
    return %arg0, %c0_i32, %c0_i32_0 : i32, i32, i32
  }
  func.func @transform_4(%arg0: i32) -> (i32, i32, i32) {
    %c0_i32 = arith.constant 0 : i32
    %c0_i32_0 = arith.constant 0 : i32
    %c0_i32_1 = arith.constant 0 : i32
    return %arg0, %c0_i32, %c0_i32_0 : i32, i32, i32
  }
}

</mosaic_0001>

<bundles_post_ra>
// kernel: _conv_lstm_cell_pallas.1
= control target key start
LH: loop header
LB: loop body
LE: loop exit
PB: predicated region body
PF: predicated region fallthrough
CT: control target
= control target key end

     0   :  { %vm1201_vm0 = vcmask 916480   ;;  %s4451_s0 = inlined_call_operand.vmem [shape: bf16[624,512], index: 0, kind: input, shape index: {}]   ;;  %s4452_s1 = inlined_call_operand.vmem [shape: bf16[128,624], index: 1, kind: input, shape index: {}]   ;;  %s4453_s2 = inlined_call_operand.vmem [shape: f32[32,512], index: 2, kind: input, shape index: {}]   ;;  %s4454_s4 = inlined_call_operand.vmem [shape: f32[2,32,256], index: 4, kind: output, shape index: {1}]   ;;  %s4455_s3 = inlined_call_operand.vmem [shape: f32[2,32,256], index: 3, kind: output, shape index: {0}]  }
   0x1   :  { %v2879_v0 = vld [vmem:[%s4451_s0 + $0x4] ss:$16 sps:$4 sm:$0xff]   ;;  %v2881_v1 = vld [vmem:[%s4451_s0 + $0xc] ss:$16 sps:$4 sm:$0xff]   ;;  %v2883_v2 = vld [vmem:[%s4451_s0] ss:$16 sps:$4 sm:$0xff]  }
   0x2   :  { %1226 = vmatprep.subr.bf16.mxu0 %v2879_v0  ;;  %v2884_v3 = vld [vmem:[%s4451_s0 + $0x8] ss:$16 sps:$4 sm:$0xff]   ;;  %1565 = vmatprep.subr.bf16.mxu1 %v2881_v1  ;;  %v2885_v4 = vld [vmem:[%s4451_s0 + $0x24] ss:$16 sps:$4 sm:$0xff]   ;;  %v2887_v5 = vld [vmem:[%s4451_s0 + $0x2c] ss:$16 sps:$4 sm:$0xff]  }
   0x3   :  { %1227 = vmatpush1.bf16.msra.mxu0 %v2883_v2  ;;  %1566 = vmatpush1.bf16.msra.mxu1 %v2884_v3  ;;  %v2889_v6 = vld [vmem:[%s4451_s0 + $0x20] ss:$16 sps:$4 sm:$0xff]   ;;  %v2890_v7 = vld [vmem:[%s4451_s0 + $0x28] ss:$16 sps:$4 sm:$0xff]   ;;  %v2891_v8 = vld [vmem:[%s4451_s0 + $0x44] ss:$16 sps:$4 sm:$0xff]  }
   0x4   :  { %1228 = vmatprep.subr.bf16.mxu0 %v2885_v4  ;;  %1567 = vmatprep.subr.bf16.mxu1 %v2887_v5  ;;  %v2893_v9 = vld [vmem:[%s4451_s0 + $0x4c] ss:$16 sps:$4 sm:$0xff]   ;;  %v2895_v10 = vld [vmem:[%s4451_s0 + $0x40] ss:$16 sps:$4 sm:$0xff]   ;;  %v2896_v11 = vld [vmem:[%s4451_s0 + $0x48] ss:$16 sps:$4 sm:$0xff]  }
   0x5   :  { %v2897_v12 = vld [vmem:[%s4451_s0 + $0x64] ss:$16 sps:$4 sm:$0xff]   ;;  %v2899_v13 = vld [vmem:[%s4451_s0 + $0x6c] ss:$16 sps:$4 sm:$0xff]   ;;  %v2901_v14 = vld [vmem:[%s4451_s0 + $0x60] ss:$16 sps:$4 sm:$0xff]  }
   0x6   :  { %v2902_v15 = vld [vmem:[%s4451_s0 + $0x68] ss:$16 sps:$4 sm:$0xff]   ;;  %v2903_v16 = vld [vmem:[%s4451_s0 + $0x84] ss:$16 sps:$4 sm:$0xff]   ;;  %v2905_v17 = vld [vmem:[%s4451_s0 + $0x8c] ss:$16 sps:$4 sm:$0xff]  }
   0x7   :  { %1229 = vmatpush1.bf16.msra.mxu0 %v2889_v6  ;;  %1568 = vmatpush1.bf16.msra.mxu1 %v2890_v7  ;;  %v2907_v18 = vld [vmem:[%s4451_s0 + $0x80] ss:$16 sps:$4 sm:$0xff]   ;;  %v2908_v19 = vld [vmem:[%s4451_s0 + $0x88] ss:$16 sps:$4 sm:$0xff]   ;;  %v2909_v20 = vld [vmem:[%s4451_s0 + $0xa4] ss:$16 sps:$4 sm:$0xff]  }
   0x8   :  { %1230 = vmatprep.subr.bf16.mxu0 %v2891_v8  ;;  %1569 = vmatprep.subr.bf16.mxu1 %v2893_v9  ;;  %v2911_v21 = vld [vmem:[%s4451_s0 + $0xac] ss:$16 sps:$4 sm:$0xff]   ;;  %v2913_v22 = vld [vmem:[%s4451_s0 + $0xa0] ss:$16 sps:$4 sm:$0xff]   ;;  %v2914_v23 = vld [vmem:[%s4451_s0 + $0xa8] ss:$16 sps:$4 sm:$0xff]  }
   0x9   :  { %v2915_v24 = vld [vmem:[%s4451_s0 + $0xc4] ss:$16 sps:$4 sm:$0xff]   ;;  %v2917_v25 = vld [vmem:[%s4451_s0 + $0xcc] ss:$16 sps:$4 sm:$0xff]   ;;  %v2919_v26 = vld [vmem:[%s4451_s0 + $0xc0] ss:$16 sps:$4 sm:$0xff]  }
   0xa   :  { %v2920_v27 = vld [vmem:[%s4451_s0 + $0xc8] ss:$16 sps:$4 sm:$0xff]   ;;  %v2921_v28 = vld [vmem:[%s4451_s0 + $0xe4] ss:$16 sps:$4 sm:$0xff]   ;;  %v2923_v29 = vld [vmem:[%s4451_s0 + $0xec] ss:$16 sps:$4 sm:$0xff]  }
   0xb   :  { %1231 = vmatpush1.bf16.msra.mxu0 %v2895_v10  ;;  %1570 = vmatpush1.bf16.msra.mxu1 %v2896_v11  ;;  %v2925_v30 = vld [vmem:[%s4451_s0 + $0xe0] ss:$16 sps:$4 sm:$0xff]   ;;  %v2926_v31 = vld [vmem:[%s4451_s0 + $0xe8] ss:$16 sps:$4 sm:$0xff]   ;;  %v2927_v32 = vld [vmem:[%s4451_s0 + $0x104] ss:$16 sps:$4 sm:$0xff]  }
   0xc   :  { %1232 = vmatprep.subr.bf16.mxu0 %v2897_v12  ;;  %1571 = vmatprep.subr.bf16.mxu1 %v2899_v13  ;;  %v2929_v33 = vld [vmem:[%s4451_s0 + $0x10c] ss:$16 sps:$4 sm:$0xff]   ;;  %v2931_v34 = vld [vmem:[%s4451_s0 + $0x100] ss:$16 sps:$4 sm:$0xff]   ;;  %v2932_v35 = vld [vmem:[%s4451_s0 + $0x108] ss:$16 sps:$4 sm:$0xff]  }
   0xd   :  { %v2933_v36 = vld [vmem:[%s4451_s0 + $0x124] ss:$16 sps:$4 sm:$0xff]   ;;  %v2935_v37 = vld [vmem:[%s4451_s0 + $0x12c] ss:$16 sps:$4 sm:$0xff]   ;;  %v2937_v38 = vld [vmem:[%s4451_s0 + $0x120] ss:$16 sps:$4 sm:$0xff]  }
   0xe   :  { %v2938_v39 = vld [vmem:[%s4451_s0 + $0x128] ss:$16 sps:$4 sm:$0xff]   ;;  %v2939_v40 = vld [vmem:[%s4451_s0 + $0x144] ss:$16 sps:$4 sm:$0xff]   ;;  %v2941_v41 = vld [vmem:[%s4451_s0 + $0x14c] ss:$16 sps:$4 sm:$0xff]  }
   0xf   :  { %1233 = vmatpush1.bf16.msra.mxu0 %v2901_v14  ;;  %1572 = vmatpush1.bf16.msra.mxu1 %v2902_v15  ;;  %v2943_v42 = vld [vmem:[%s4451_s0 + $0x140] ss:$16 sps:$4 sm:$0xff]   ;;  %v2944_v43 = vld [vmem:[%s4451_s0 + $0x148] ss:$16 sps:$4 sm:$0xff]   ;;  %v2945_v44 = vld [vmem:[%s4451_s0 + $0x164] ss:$16 sps:$4 sm:$0xff]  }
  0x10   :  { %1234 = vmatprep.subr.bf16.mxu0 %v2903_v16  ;;  %1573 = vmatprep.subr.bf16.mxu1 %v2905_v17  ;;  %v2947_v45 = vld [vmem:[%s4451_s0 + $0x16c] ss:$16 sps:$4 sm:$0xff]   ;;  %v2949_v46 = vld [vmem:[%s4451_s0 + $0x160] ss:$16 sps:$4 sm:$0xff]   ;;  %v2950_v47 = vld [vmem:[%s4451_s0 + $0x168] ss:$16 sps:$4 sm:$0xff]  }
  0x11   :  { %v2977_v48 = vld [vmem:[%s4452_s1 + $0x4] ss:$20 sps:$4 sm:$0xff]   ;;  %v2953_v50 = vld [vmem:[%s4451_s0 + $0x18c] ss:$16 sps:$4 sm:$0xff]   ;;  %v2955_v51 = vld [vmem:[%s4451_s0 + $0x180] ss:$16 sps:$4 sm:$0xff]  }
  0x12   :  { %v2951_v49 = vld [vmem:[%s4451_s0 + $0x184] ss:$16 sps:$4 sm:$0xff]   ;;  %1258 = vmatprep.mubr.bf16.mxu0 %v2977_v48  ;;  %1597 = vmatprep.mubr.bf16.mxu1 %v2977_v48  ;;  %v2956_v52 = vld [vmem:[%s4451_s0 + $0x188] ss:$16 sps:$4 sm:$0xff]   ;;  %v2959_v54 = vld [vmem:[%s4451_s0 + $0x1ac] ss:$16 sps:$4 sm:$0xff]  }
  0x13   :  { %1235 = vmatpush1.bf16.msra.mxu0 %v2907_v18  ;;  %1574 = vmatpush1.bf16.msra.mxu1 %v2908_v19  ;;  %v2957_v53 = vld [vmem:[%s4451_s0 + $0x1a4] ss:$16 sps:$4 sm:$0xff]   ;;  %v2961_v55 = vld [vmem:[%s4451_s0 + $0x1a0] ss:$16 sps:$4 sm:$0xff]   ;;  %v2962_v56 = vld [vmem:[%s4451_s0 + $0x1a8] ss:$16 sps:$4 sm:$0xff]  }
  0x14   :  { %1236 = vmatprep.subr.bf16.mxu0 %v2909_v20  ;;  %1575 = vmatprep.subr.bf16.mxu1 %v2911_v21  ;;  %v2963_v57 = vld [vmem:[%s4451_s0 + $0x1c4] ss:$16 sps:$4 sm:$0xff]   ;;  %v2965_v58 = vld [vmem:[%s4451_s0 + $0x1cc] ss:$16 sps:$4 sm:$0xff]   ;;  %v2967_v59 = vld [vmem:[%s4451_s0 + $0x1c0] ss:$16 sps:$4 sm:$0xff]  }
  0x15   :  { %v2968_v60 = vld [vmem:[%s4451_s0 + $0x1c8] ss:$16 sps:$4 sm:$0xff]   ;;  %v2969_v61 = vld [vmem:[%s4451_s0 + $0x1e4] ss:$16 sps:$4 sm:$0xff]   ;;  %v2971_v62 = vld [vmem:[%s4451_s0 + $0x1ec] ss:$16 sps:$4 sm:$0xff]  }
  0x16   :  { %v2973_v63 = vld [vmem:[%s4451_s0 + $0x1e0] ss:$16 sps:$4 sm:$0xff]   ;;  %v2974_v0 = vld [vmem:[%s4451_s0 + $0x1e8] ss:$16 sps:$4 sm:$0xff]   ;;  %v2980_v1 = vld [vmem:[%s4451_s0 + $0x204] ss:$16 sps:$4 sm:$0xff]  }
  0x17   :  { %1237 = vmatpush1.bf16.msra.mxu0 %v2913_v22  ;;  %1576 = vmatpush1.bf16.msra.mxu1 %v2914_v23  ;;  %v2983_v2 = vld [vmem:[%s4451_s0 + $0x20c] ss:$16 sps:$4 sm:$0xff]   ;;  %v2975_v3 = vld [vmem:[%s4452_s1] ss:$20 sps:$4 sm:$0xff]   ;;  %v2981_v5 = vld [vmem:[%s4451_s0 + $0x208] ss:$16 sps:$4 sm:$0xff]  }
  0x18   :  { %1238 = vmatprep.subr.bf16.mxu0 %v2915_v24  ;;  %1577 = vmatprep.subr.bf16.mxu1 %v2917_v25  ;;  %v2978_v4 = vld [vmem:[%s4451_s0 + $0x200] ss:$16 sps:$4 sm:$0xff]   ;;  %v2986_v6 = vld [vmem:[%s4451_s0 + $0x224] ss:$16 sps:$4 sm:$0xff]   ;;  %v2989_v7 = vld [vmem:[%s4451_s0 + $0x22c] ss:$16 sps:$4 sm:$0xff]  }
  0x19   :  { %v2990_v8 = vld [vmem:[%s4452_s1 + $0x2c] ss:$20 sps:$4 sm:$0xff]   ;;  %v2987_v10 = vld [vmem:[%s4451_s0 + $0x228] ss:$16 sps:$4 sm:$0xff]   ;;  %v2995_v11 = vld [vmem:[%s4451_s0 + $0x244] ss:$16 sps:$4 sm:$0xff]  }
  0x1a   :  { %v2984_v9 = vld [vmem:[%s4451_s0 + $0x220] ss:$16 sps:$4 sm:$0xff]   ;;  %v2998_v12 = vld [vmem:[%s4451_s0 + $0x24c] ss:$16 sps:$4 sm:$0xff]   ;;  %v2996_v15 = vld [vmem:[%s4451_s0 + $0x248] ss:$16 sps:$4 sm:$0xff]  }
  0x1b   :  { %1239 = vmatpush1.bf16.msra.mxu0 %v2919_v26  ;;  %1578 = vmatpush1.bf16.msra.mxu1 %v2920_v27  ;;  %v2992_v13 = vld [vmem:[%s4452_s1 + $0x28] ss:$20 sps:$4 sm:$0xff]   ;;  %v2993_v14 = vld [vmem:[%s4451_s0 + $0x240] ss:$16 sps:$4 sm:$0xff]   ;;  %v3001_v16 = vld [vmem:[%s4451_s0 + $0x264] ss:$16 sps:$4 sm:$0xff]  }
  0x1c   :  { %1240 = vmatprep.subr.bf16.mxu0 %v2921_v28  ;;  %1579 = vmatprep.subr.bf16.mxu1 %v2923_v29  ;;  %v3004_v17 = vld [vmem:[%s4451_s0 + $0x26c] ss:$16 sps:$4 sm:$0xff]   ;;  %v3005_v18 = vld [vmem:[%s4452_s1 + $0x54] ss:$20 sps:$4 sm:$0xff]   ;;  %v2999_v19 = vld [vmem:[%s4451_s0 + $0x260] ss:$16 sps:$4 sm:$0xff]  }
  0x1d   :  { %v3002_v20 = vld [vmem:[%s4451_s0 + $0x268] ss:$16 sps:$4 sm:$0xff]   ;;  %v3010_v21 = vld [vmem:[%s4451_s0 + $0x284] ss:$16 sps:$4 sm:$0xff]   ;;  %v3013_v22 = vld [vmem:[%s4451_s0 + $0x28c] ss:$16 sps:$4 sm:$0xff]  }
  0x1e   :  { %v3007_v23 = vld [vmem:[%s4452_s1 + $0x50] ss:$20 sps:$4 sm:$0xff]   ;;  %v3011_v25 = vld [vmem:[%s4451_s0 + $0x288] ss:$16 sps:$4 sm:$0xff]   ;;  %v3019_v27 = vld [vmem:[%s4451_s0 + $0x2ac] ss:$16 sps:$4 sm:$0xff]  }
  0x1f   :  { %1241 = vmatpush1.bf16.msra.mxu0 %v2925_v30  ;;  %1580 = vmatpush1.bf16.msra.mxu1 %v2926_v31  ;;  %v3008_v24 = vld [vmem:[%s4451_s0 + $0x280] ss:$16 sps:$4 sm:$0xff]   ;;  %v3016_v26 = vld [vmem:[%s4451_s0 + $0x2a4] ss:$16 sps:$4 sm:$0xff]   ;;  %v3017_v30 = vld [vmem:[%s4451_s0 + $0x2a8] ss:$16 sps:$4 sm:$0xff]  }
  0x20   :  { %1242 = vmatprep.subr.bf16.mxu0 %v2927_v32  ;;  %1581 = vmatprep.subr.bf16.mxu1 %v2929_v33  ;;  %v3020_v28 = vld [vmem:[%s4452_s1 + $0x7c] ss:$20 sps:$4 sm:$0xff]   ;;  %v3025_v31 = vld [vmem:[%s4451_s0 + $0x2c4] ss:$16 sps:$4 sm:$0xff]   ;;  %v3022_v33 = vld [vmem:[%s4452_s1 + $0x78] ss:$20 sps:$4 sm:$0xff]  }
  0x21   :  { %v3014_v29 = vld [vmem:[%s4451_s0 + $0x2a0] ss:$16 sps:$4 sm:$0xff]   ;;  %v3028_v32 = vld [vmem:[%s4451_s0 + $0x2cc] ss:$16 sps:$4 sm:$0xff]  }
  0x22   :  { %v3050_v48 = vld [vmem:[%s4452_s1 + $0xcc] ss:$20 sps:$4 sm:$0xff]  }
  0x23   :  { %1243 = vmatpush1.bf16.msra.mxu0 %v2931_v34  ;;  %1582 = vmatpush1.bf16.msra.mxu1 %v2932_v35  ;;  %v3023_v34 = vld [vmem:[%s4451_s0 + $0x2c0] ss:$16 sps:$4 sm:$0xff]   ;;  %v3026_v35 = vld [vmem:[%s4451_s0 + $0x2c8] ss:$16 sps:$4 sm:$0xff]  }
  0x24   :  { %1244 = vmatprep.subr.bf16.mxu0 %v2933_v36  ;;  %1583 = vmatprep.subr.bf16.mxu1 %v2935_v37  ;;  %v3031_v36 = vld [vmem:[%s4451_s0 + $0x2e4] ss:$16 sps:$4 sm:$0xff]   ;;  %v3034_v37 = vld [vmem:[%s4451_s0 + $0x2ec] ss:$16 sps:$4 sm:$0xff]  }
  0x27   :  { %1245 = vmatpush1.bf16.msra.mxu0 %v2937_v38  ;;  %1584 = vmatpush1.bf16.msra.mxu1 %v2938_v39  ;;  %v3035_v38 = vld [vmem:[%s4452_s1 + $0xa4] ss:$20 sps:$4 sm:$0xff]   ;;  %v3029_v39 = vld [vmem:[%s4451_s0 + $0x2e0] ss:$16 sps:$4 sm:$0xff]  }
  0x28   :  { %1246 = vmatprep.subr.bf16.mxu0 %v2939_v40  ;;  %1585 = vmatprep.subr.bf16.mxu1 %v2941_v41  ;;  %v3032_v40 = vld [vmem:[%s4451_s0 + $0x2e8] ss:$16 sps:$4 sm:$0xff]   ;;  %v3040_v41 = vld [vmem:[%s4451_s0 + $0x304] ss:$16 sps:$4 sm:$0xff]  }
  0x2b   :  { %1247 = vmatpush1.bf16.msra.mxu0 %v2943_v42  ;;  %1586 = vmatpush1.bf16.msra.mxu1 %v2944_v43  ;;  %v3043_v42 = vld [vmem:[%s4451_s0 + $0x30c] ss:$16 sps:$4 sm:$0xff]   ;;  %v3037_v43 = vld [vmem:[%s4452_s1 + $0xa0] ss:$20 sps:$4 sm:$0xff]  }
  0x2c   :  { %1248 = vmatprep.subr.bf16.mxu0 %v2945_v44  ;;  %1587 = vmatprep.subr.bf16.mxu1 %v2947_v45  ;;  %v3038_v44 = vld [vmem:[%s4451_s0 + $0x300] ss:$16 sps:$4 sm:$0xff]   ;;  %v3041_v45 = vld [vmem:[%s4451_s0 + $0x308] ss:$16 sps:$4 sm:$0xff]  }
  0x2f   :  { %1249 = vmatpush1.bf16.msra.mxu0 %v2949_v46  ;;  %1588 = vmatpush1.bf16.msra.mxu1 %v2950_v47  ;;  %v3046_v46 = vld [vmem:[%s4451_s0 + $0x324] ss:$16 sps:$4 sm:$0xff]   ;;  %v3049_v47 = vld [vmem:[%s4451_s0 + $0x32c] ss:$16 sps:$4 sm:$0xff]  }
  0x30   :  { %1250 = vmatprep.subr.bf16.mxu0 %v2951_v49  ;;  %1589 = vmatprep.subr.bf16.mxu1 %v2953_v50  ;;  %v3044_v49 = vld [vmem:[%s4451_s0 + $0x320] ss:$16 sps:$4 sm:$0xff]   ;;  %v3047_v50 = vld [vmem:[%s4451_s0 + $0x328] ss:$16 sps:$4 sm:$0xff]  }
  0x33   :  { %1251 = vmatpush1.bf16.msra.mxu0 %v2955_v51  ;;  %1590 = vmatpush1.bf16.msra.mxu1 %v2956_v52  ;;  %v3055_v51 = vld [vmem:[%s4451_s0 + $0x344] ss:$16 sps:$4 sm:$0xff]   ;;  %v3058_v52 = vld [vmem:[%s4451_s0 + $0x34c] ss:$16 sps:$4 sm:$0xff]  }
  0x34   :  { %1252 = vmatprep.subr.bf16.mxu0 %v2957_v53  ;;  %1591 = vmatprep.subr.bf16.mxu1 %v2959_v54  ;;  %v3052_v53 = vld [vmem:[%s4452_s1 + $0xc8] ss:$20 sps:$4 sm:$0xff]   ;;  %v3053_v54 = vld [vmem:[%s4451_s0 + $0x340] ss:$16 sps:$4 sm:$0xff]  }
  0x37   :  { %1253 = vmatpush1.bf16.msra.mxu0 %v2961_v55  ;;  %1592 = vmatpush1.bf16.msra.mxu1 %v2962_v56  ;;  %v3056_v55 = vld [vmem:[%s4451_s0 + $0x348] ss:$16 sps:$4 sm:$0xff]   ;;  %v3061_v56 = vld [vmem:[%s4451_s0 + $0x364] ss:$16 sps:$4 sm:$0xff]  }
  0x38   :  { %1254 = vmatprep.subr.bf16.mxu0 %v2963_v57  ;;  %1593 = vmatprep.subr.bf16.mxu1 %v2965_v58  ;;  %v3064_v57 = vld [vmem:[%s4451_s0 + $0x36c] ss:$16 sps:$4 sm:$0xff]   ;;  %v3065_v58 = vld [vmem:[%s4452_s1 + $0xf4] ss:$20 sps:$4 sm:$0xff]  }
  0x3b   :  { %1255 = vmatpush1.bf16.msra.mxu0 %v2967_v59  ;;  %1594 = vmatpush1.bf16.msra.mxu1 %v2968_v60  ;;  %v3059_v59 = vld [vmem:[%s4451_s0 + $0x360] ss:$16 sps:$4 sm:$0xff]   ;;  %v3062_v60 = vld [vmem:[%s4451_s0 + $0x368] ss:$16 sps:$4 sm:$0xff]  }
  0x3c   :  { %1256 = vmatprep.subr.bf16.mxu0 %v2969_v61  ;;  %1595 = vmatprep.subr.bf16.mxu1 %v2971_v62  ;;  %v3070_v61 = vld [vmem:[%s4451_s0 + $0x384] ss:$16 sps:$4 sm:$0xff]   ;;  %v3073_v62 = vld [vmem:[%s4451_s0 + $0x38c] ss:$16 sps:$4 sm:$0xff]  }
  0x3f   :  { %1257 = vmatpush1.bf16.msra.mxu0 %v2973_v63  ;;  %1596 = vmatpush1.bf16.msra.mxu1 %v2974_v0  ;;  %v3067_v63 = vld [vmem:[%s4452_s1 + $0xf0] ss:$20 sps:$4 sm:$0xff]  }
  0x40   :  { %1339 = vmatprep.subr.bf16.mxu0 %v2980_v1  ;;  %1678 = vmatprep.subr.bf16.mxu1 %v2983_v2  ;;  %v3068_v0 = vld [vmem:[%s4451_s0 + $0x380] ss:$16 sps:$4 sm:$0xff]   ;;  %v3071_v1 = vld [vmem:[%s4451_s0 + $0x388] ss:$16 sps:$4 sm:$0xff]   ;;  %v3076_v2 = vld [vmem:[%s4451_s0 + $0x3a4] ss:$16 sps:$4 sm:$0xff]  }
  0x42   :  { %1259 = vmatmul.mubr.bf16.vlgmr.msra.gmra.mrb[0].mxu0 %v2975_v3  ;;  %1598 = vmatmul.mubr.bf16.vlgmr.msra.gmra.mrb[0].mxu1 %v2975_v3  ;;  %v3079_v3 = vld [vmem:[%s4451_s0 + $0x3ac] ss:$16 sps:$4 sm:$0xff]  }
  0x43   :  { %1340 = vmatpush1.bf16.msra.mxu0 %v2978_v4  ;;  %1679 = vmatpush1.bf16.msra.mxu1 %v2981_v5  ;;  %v3080_v4 = vld [vmem:[%s4452_s1 + $0x11c] ss:$20 sps:$4 sm:$0xff]  }
  0x44   :  { %1341 = vmatprep.subr.bf16.mxu0 %v2986_v6  ;;  %1680 = vmatprep.subr.bf16.mxu1 %v2989_v7  ;;  %v3074_v5 = vld [vmem:[%s4451_s0 + $0x3a0] ss:$16 sps:$4 sm:$0xff]   ;;  %v3077_v6 = vld [vmem:[%s4451_s0 + $0x3a8] ss:$16 sps:$4 sm:$0xff]   ;;  %v3085_v7 = vld [vmem:[%s4451_s0 + $0x3c4] ss:$16 sps:$4 sm:$0xff]  }
  0x45   :  { %1268 = vmatprep.mubr.bf16.mxu0 %v2990_v8  ;;  %1607 = vmatprep.mubr.bf16.mxu1 %v2990_v8  ;;  %v3088_v8 = vld [vmem:[%s4451_s0 + $0x3cc] ss:$16 sps:$4 sm:$0xff]  }
  0x47   :  { %1342 = vmatpush1.bf16.msra.mxu0 %v2984_v9  ;;  %1681 = vmatpush1.bf16.msra.mxu1 %v2987_v10  ;;  %v3082_v9 = vld [vmem:[%s4452_s1 + $0x118] ss:$20 sps:$4 sm:$0xff]   ;;  %v3083_v10 = vld [vmem:[%s4451_s0 + $0x3c0] ss:$16 sps:$4 sm:$0xff]  }
  0x48   :  { %1343 = vmatprep.subr.bf16.mxu0 %v2995_v11  ;;  %1682 = vmatprep.subr.bf16.mxu1 %v2998_v12  ;;  %v3086_v11 = vld [vmem:[%s4451_s0 + $0x3c8] ss:$16 sps:$4 sm:$0xff]   ;;  %v3091_v12 = vld [vmem:[%s4451_s0 + $0x3e4] ss:$16 sps:$4 sm:$0xff]  }
  0x4a   :  { %1269 = vmatmul.mubr.bf16.gmra.mrb[4].mxu0 %v2992_v13  ;;  %1608 = vmatmul.mubr.bf16.gmra.mrb[4].mxu1 %v2992_v13  ;;  %v3094_v13 = vld [vmem:[%s4451_s0 + $0x3ec] ss:$16 sps:$4 sm:$0xff]  }
  0x4b   :  { %1344 = vmatpush1.bf16.msra.mxu0 %v2993_v14  ;;  %1683 = vmatpush1.bf16.msra.mxu1 %v2996_v15  ;;  %v3097_v14 = vld [vmem:[%s4452_s1 + $0xc] ss:$20 sps:$4 sm:$0xff]  }
  0x4c   :  { %1345 = vmatprep.subr.bf16.mxu0 %v3001_v16  ;;  %1684 = vmatprep.subr.bf16.mxu1 %v3004_v17  ;;  %v3089_v15 = vld [vmem:[%s4451_s0 + $0x3e0] ss:$16 sps:$4 sm:$0xff]   ;;  %v3092_v16 = vld [vmem:[%s4451_s0 + $0x3e8] ss:$16 sps:$4 sm:$0xff]   ;;  %v3100_v17 = vld [vmem:[%s4451_s0 + $0x404] ss:$16 sps:$4 sm:$0xff]  }
  0x4d   :  { %1278 = vmatprep.mubr.bf16.mxu0 %v3005_v18  ;;  %1617 = vmatprep.mubr.bf16.mxu1 %v3005_v18  ;;  %v3095_v18 = vld [vmem:[%s4452_s1 + $0x8] ss:$20 sps:$4 sm:$0xff]  }
  0x4f   :  { %1346 = vmatpush1.bf16.msra.mxu0 %v2999_v19  ;;  %1685 = vmatpush1.bf16.msra.mxu1 %v3002_v20  ;;  %v3103_v19 = vld [vmem:[%s4451_s0 + $0x40c] ss:$16 sps:$4 sm:$0xff]   ;;  %v3098_v20 = vld [vmem:[%s4451_s0 + $0x400] ss:$16 sps:$4 sm:$0xff]  }
  0x50   :  { %1347 = vmatprep.subr.bf16.mxu0 %v3010_v21  ;;  %1686 = vmatprep.subr.bf16.mxu1 %v3013_v22  ;;  %v3101_v21 = vld [vmem:[%s4451_s0 + $0x408] ss:$16 sps:$4 sm:$0xff]  }
  0x51   :  { %v3104_v22 = vld [vmem:[%s4452_s1 + $0x34] ss:$20 sps:$4 sm:$0xff]  }
  0x52   :  { %1279 = vmatmul.mubr.bf16.gmra.mrb[8].mxu0 %v3007_v23  ;;  %1618 = vmatmul.mubr.bf16.gmra.mrb[8].mxu1 %v3007_v23  ;;  %v3109_v23 = vld [vmem:[%s4451_s0 + $0x424] ss:$16 sps:$4 sm:$0xff]  }
  0x53   :  { %1348 = vmatpush1.bf16.msra.mxu0 %v3008_v24  ;;  %1687 = vmatpush1.bf16.msra.mxu1 %v3011_v25  ;;  %v3112_v24 = vld [vmem:[%s4451_s0 + $0x42c] ss:$16 sps:$4 sm:$0xff]   ;;  %v3107_v25 = vld [vmem:[%s4451_s0 + $0x420] ss:$16 sps:$4 sm:$0xff]  }
  0x54   :  { %1349 = vmatprep.subr.bf16.mxu0 %v3016_v26  ;;  %1688 = vmatprep.subr.bf16.mxu1 %v3019_v27  ;;  %v3110_v26 = vld [vmem:[%s4451_s0 + $0x428] ss:$16 sps:$4 sm:$0xff]   ;;  %v3118_v27 = vld [vmem:[%s4451_s0 + $0x444] ss:$16 sps:$4 sm:$0xff]  }
  0x55   :  { %1288 = vmatprep.mubr.bf16.mxu0 %v3020_v28  ;;  %1627 = vmatprep.mubr.bf16.mxu1 %v3020_v28  ;;  %v3121_v28 = vld [vmem:[%s4451_s0 + $0x44c] ss:$16 sps:$4 sm:$0xff]  }
  0x57   :  { %1350 = vmatpush1.bf16.msra.mxu0 %v3014_v29  ;;  %1689 = vmatpush1.bf16.msra.mxu1 %v3017_v30  ;;  %v3106_v29 = vld [vmem:[%s4452_s1 + $0x30] ss:$20 sps:$4 sm:$0xff]  }
  0x58   :  { %1351 = vmatprep.subr.bf16.mxu0 %v3025_v31  ;;  %1690 = vmatprep.subr.bf16.mxu1 %v3028_v32  ;;  %v3113_v30 = vld [vmem:[%s4452_s1 + $0x5c] ss:$20 sps:$4 sm:$0xff]   ;;  %v3119_v32 = vld [vmem:[%s4451_s0 + $0x448] ss:$16 sps:$4 sm:$0xff]  }
  0x59   :  { %v3116_v31 = vld [vmem:[%s4451_s0 + $0x440] ss:$16 sps:$4 sm:$0xff]  }
  0x5a   :  { %1289 = vmatmul.mubr.bf16.gmra.mrb[12].mxu0 %v3022_v33  ;;  %1628 = vmatmul.mubr.bf16.gmra.mrb[12].mxu1 %v3022_v33  ;;  %v3127_v33 = vld [vmem:[%s4451_s0 + $0x464] ss:$16 sps:$4 sm:$0xff]  }
  0x5b   :  { %1352 = vmatpush1.bf16.msra.mxu0 %v3023_v34  ;;  %1691 = vmatpush1.bf16.msra.mxu1 %v3026_v35  ;;  %v3130_v34 = vld [vmem:[%s4451_s0 + $0x46c] ss:$16 sps:$4 sm:$0xff]   ;;  %v3125_v35 = vld [vmem:[%s4451_s0 + $0x460] ss:$16 sps:$4 sm:$0xff]  }
  0x5c   :  { %1353 = vmatprep.subr.bf16.mxu0 %v3031_v36  ;;  %1692 = vmatprep.subr.bf16.mxu1 %v3034_v37  ;;  %v3128_v36 = vld [vmem:[%s4451_s0 + $0x468] ss:$16 sps:$4 sm:$0xff]   ;;  %v3136_v37 = vld [vmem:[%s4451_s0 + $0x484] ss:$16 sps:$4 sm:$0xff]  }
  0x5d   :  { %1298 = vmatprep.mubr.bf16.mxu0 %v3035_v38  ;;  %1637 = vmatprep.mubr.bf16.mxu1 %v3035_v38  ;;  %v3139_v38 = vld [vmem:[%s4451_s0 + $0x48c] ss:$16 sps:$4 sm:$0xff]  }
  0x5f   :  { %1354 = vmatpush1.bf16.msra.mxu0 %v3029_v39  ;;  %1693 = vmatpush1.bf16.msra.mxu1 %v3032_v40  ;;  %v3115_v39 = vld [vmem:[%s4452_s1 + $0x58] ss:$20 sps:$4 sm:$0xff]  }
  0x60   :  { %1355 = vmatprep.subr.bf16.mxu0 %v3040_v41  ;;  %1694 = vmatprep.subr.bf16.mxu1 %v3043_v42  ;;  %v3122_v40 = vld [vmem:[%s4452_s1 + $0x84] ss:$20 sps:$4 sm:$0xff]   ;;  %v3134_v41 = vld [vmem:[%s4451_s0 + $0x480] ss:$16 sps:$4 sm:$0xff]  }
  0x61   :  { %v3137_v42 = vld [vmem:[%s4451_s0 + $0x488] ss:$16 sps:$4 sm:$0xff]  }
  0x62   :  { %1299 = vmatmul.mubr.bf16.gmra.mrb[16].mxu0 %v3037_v43  ;;  %1638 = vmatmul.mubr.bf16.gmra.mrb[16].mxu1 %v3037_v43  ;;  %v3145_v43 = vld [vmem:[%s4451_s0 + $0x4a4] ss:$16 sps:$4 sm:$0xff]  }
  0x63   :  { %1356 = vmatpush1.bf16.msra.mxu0 %v3038_v44  ;;  %1695 = vmatpush1.bf16.msra.mxu1 %v3041_v45  ;;  %v3148_v44 = vld [vmem:[%s4451_s0 + $0x4ac] ss:$16 sps:$4 sm:$0xff]   ;;  %v3143_v45 = vld [vmem:[%s4451_s0 + $0x4a0] ss:$16 sps:$4 sm:$0xff]  }
  0x64   :  { %1357 = vmatprep.subr.bf16.mxu0 %v3046_v46  ;;  %1696 = vmatprep.subr.bf16.mxu1 %v3049_v47  ;;  %v3146_v46 = vld [vmem:[%s4451_s0 + $0x4a8] ss:$16 sps:$4 sm:$0xff]   ;;  %v3156_v47 = vld [vmem:[%s4451_s0 + $0x4c4] ss:$16 sps:$4 sm:$0xff]  }
  0x65   :  { %1308 = vmatprep.mubr.bf16.mxu0 %v3050_v48  ;;  %1647 = vmatprep.mubr.bf16.mxu1 %v3050_v48  ;;  %v3159_v48 = vld [vmem:[%s4451_s0 + $0x4cc] ss:$16 sps:$4 sm:$0xff]  }
  0x67   :  { %1358 = vmatpush1.bf16.msra.mxu0 %v3044_v49  ;;  %1697 = vmatpush1.bf16.msra.mxu1 %v3047_v50  ;;  %v3124_v49 = vld [vmem:[%s4452_s1 + $0x80] ss:$20 sps:$4 sm:$0xff]  }
  0x68   :  { %1359 = vmatprep.subr.bf16.mxu0 %v3055_v51  ;;  %1698 = vmatprep.subr.bf16.mxu1 %v3058_v52  ;;  %v3131_v50 = vld [vmem:[%s4452_s1 + $0xac] ss:$20 sps:$4 sm:$0xff]   ;;  %v3157_v52 = vld [vmem:[%s4451_s0 + $0x4c8] ss:$16 sps:$4 sm:$0xff]  }
  0x69   :  { %v3154_v51 = vld [vmem:[%s4451_s0 + $0x4c0] ss:$16 sps:$4 sm:$0xff]  }
  0x6a   :  { %1309 = vmatmul.mubr.bf16.gmra.mrb[20].mxu0 %v3052_v53  ;;  %1648 = vmatmul.mubr.bf16.gmra.mrb[20].mxu1 %v3052_v53  ;;  %v3133_v53 = vld [vmem:[%s4452_s1 + $0xa8] ss:$20 sps:$4 sm:$0xff]  }
  0x6b   :  { %1360 = vmatpush1.bf16.msra.mxu0 %v3053_v54  ;;  %1699 = vmatpush1.bf16.msra.mxu1 %v3056_v55  ;;  %v3140_v54 = vld [vmem:[%s4452_s1 + $0xd4] ss:$20 sps:$4 sm:$0xff]   ;;  %v3142_v55 = vld [vmem:[%s4452_s1 + $0xd0] ss:$20 sps:$4 sm:$0xff]  }
  0x6c   :  { %1361 = vmatprep.subr.bf16.mxu0 %v3061_v56  ;;  %1700 = vmatprep.subr.bf16.mxu1 %v3064_v57  ;;  %v3149_v56 = vld [vmem:[%s4452_s1 + $0xfc] ss:$20 sps:$4 sm:$0xff]   ;;  %v3151_v57 = vld [vmem:[%s4452_s1 + $0xf8] ss:$20 sps:$4 sm:$0xff]  }
  0x6d   :  { %1318 = vmatprep.mubr.bf16.mxu0 %v3065_v58  ;;  %1657 = vmatprep.mubr.bf16.mxu1 %v3065_v58  ;;  %v3152_v58 = vld [vmem:[%s4452_s1 + $0x124] ss:$20 sps:$4 sm:$0xff]  }
  0x6f   :  { %1362 = vmatpush1.bf16.msra.mxu0 %v3059_v59  ;;  %1701 = vmatpush1.bf16.msra.mxu1 %v3062_v60  ;;  %v3160_v59 = vld [vmem:[%s4452_s1 + $0x120] ss:$20 sps:$4 sm:$0xff]   ;;  %v3425_v60 = vmov 0  }
  0x70   :  { %1363 = vmatprep.subr.bf16.mxu0 %v3070_v61  ;;  %1702 = vmatprep.subr.bf16.mxu1 %v3073_v62  ;;  %v3161_v61 = vld [vmem:[%s4452_s1 + $0x10] ss:$20 sps:$4 sm:$0xff]   ;;  %v3162_v62 = vld [vmem:[%s4452_s1 + $0x38] ss:$20 sps:$4 sm:$0xff]  }
  0x72   :  { %1319 = vmatmul.mubr.bf16.gmra.mrb[24].mxu0 %v3067_v63  ;;  %1658 = vmatmul.mubr.bf16.gmra.mrb[24].mxu1 %v3067_v63  ;;  %v3163_v63 = vld [vmem:[%s4452_s1 + $0x60] ss:$20 sps:$4 sm:$0xff]  }
  0x73   :  { %1364 = vmatpush1.bf16.msra.mxu0 %v3068_v0  ;;  %1703 = vmatpush1.bf16.msra.mxu1 %v3071_v1  ;;  %v3164_v0 = vld [vmem:[%s4452_s1 + $0x88] ss:$20 sps:$4 sm:$0xff]   ;;  %v3165_v1 = vld [vmem:[%s4452_s1 + $0xb0] ss:$20 sps:$4 sm:$0xff]  }
  0x74   :  { %1365 = vmatprep.subr.bf16.mxu0 %v3076_v2  ;;  %1704 = vmatprep.subr.bf16.mxu1 %v3079_v3  ;;  %v3166_v2 = vld [vmem:[%s4452_s1 + $0xd8] ss:$20 sps:$4 sm:$0xff]   ;;  %v3167_v3 = vld [vmem:[%s4452_s1 + $0x100] ss:$20 sps:$4 sm:$0xff]  }
  0x75   :  { %1328 = vmatprep.mubr.bf16.mxu0 %v3080_v4  ;;  %1667 = vmatprep.mubr.bf16.mxu1 %v3080_v4  ;;  %v3168_v4 = vld [vmem:[%s4452_s1 + $0x128] ss:$20 sps:$4 sm:$0xff]  }
  0x77   :  { %1366 = vmatpush1.bf16.msra.mxu0 %v3074_v5  ;;  %1705 = vmatpush1.bf16.msra.mxu1 %v3077_v6 }
  0x78   :  { %1367 = vmatprep.subr.bf16.mxu0 %v3085_v7  ;;  %1706 = vmatprep.subr.bf16.mxu1 %v3088_v8 }
  0x7a   :  { %1329 = vmatmul.mubr.bf16.gmra.mrb[28].mxu0 %v3082_v9  ;;  %1668 = vmatmul.mubr.bf16.gmra.mrb[28].mxu1 %v3082_v9 }
  0x7b   :  { %1368 = vmatpush1.bf16.msra.mxu0 %v3083_v10  ;;  %1707 = vmatpush1.bf16.msra.mxu1 %v3086_v11 }
  0x7c   :  { %1369 = vmatprep.subr.bf16.mxu0 %v3091_v12  ;;  %1708 = vmatprep.subr.bf16.mxu1 %v3094_v13 }
  0x7d   :  { %1371 = vmatprep.mubr.bf16.mxu0 %v3097_v14  ;;  %1710 = vmatprep.mubr.bf16.mxu1 %v3097_v14 }
  0x7f   :  { %1370 = vmatpush1.bf16.msra.mxu0 %v3089_v15  ;;  %1709 = vmatpush1.bf16.msra.mxu1 %v3092_v16 }
  0x80   :  { %1452 = vmatprep.subr.bf16.mxu0 %v3100_v17  ;;  %1791 = vmatprep.subr.bf16.mxu1 %v3103_v19 }
  0x82   :  { %1372 = vmatmul.mubr.bf16.vlgmr.msra.gmra.mrb[0].mxu0 %v3095_v18  ;;  %1711 = vmatmul.mubr.bf16.vlgmr.msra.gmra.mrb[0].mxu1 %v3095_v18 }
  0x83   :  { %1453 = vmatpush1.bf16.msra.mxu0 %v3098_v20  ;;  %1792 = vmatpush1.bf16.msra.mxu1 %v3101_v21 }
  0x84   :  { %1381 = vmatprep.mubr.bf16.mxu0 %v3104_v22  ;;  %1720 = vmatprep.mubr.bf16.mxu1 %v3104_v22 }
  0x85   :  { %1454 = vmatprep.subr.bf16.mxu0 %v3109_v23  ;;  %1793 = vmatprep.subr.bf16.mxu1 %v3112_v24 }
  0x87   :  { %1455 = vmatpush1.bf16.msra.mxu0 %v3107_v25  ;;  %1794 = vmatpush1.bf16.msra.mxu1 %v3110_v26 }
  0x88   :  { %1456 = vmatprep.subr.bf16.mxu0 %v3118_v27  ;;  %1795 = vmatprep.subr.bf16.mxu1 %v3121_v28 }
  0x8a   :  { %1382 = vmatmul.mubr.bf16.gmra.mrb[4].mxu0 %v3106_v29  ;;  %1721 = vmatmul.mubr.bf16.gmra.mrb[4].mxu1 %v3106_v29 }
  0x8b   :  { %1391 = vmatprep.mubr.bf16.mxu0 %v3113_v30  ;;  %1730 = vmatprep.mubr.bf16.mxu1 %v3113_v30 }
  0x8c   :  { %1457 = vmatpush1.bf16.msra.mxu0 %v3116_v31  ;;  %1796 = vmatpush1.bf16.msra.mxu1 %v3119_v32 }
  0x8d   :  { %1458 = vmatprep.subr.bf16.mxu0 %v3127_v33  ;;  %1797 = vmatprep.subr.bf16.mxu1 %v3130_v34 }
  0x90   :  { %1459 = vmatpush1.bf16.msra.mxu0 %v3125_v35  ;;  %1798 = vmatpush1.bf16.msra.mxu1 %v3128_v36 }
  0x91   :  { %1460 = vmatprep.subr.bf16.mxu0 %v3136_v37  ;;  %1799 = vmatprep.subr.bf16.mxu1 %v3139_v38 }
  0x92   :  { %1392 = vmatmul.mubr.bf16.gmra.mrb[8].mxu0 %v3115_v39  ;;  %1731 = vmatmul.mubr.bf16.gmra.mrb[8].mxu1 %v3115_v39 }
  0x93   :  { %1401 = vmatprep.mubr.bf16.mxu0 %v3122_v40  ;;  %1740 = vmatprep.mubr.bf16.mxu1 %v3122_v40 }
  0x94   :  { %1461 = vmatpush1.bf16.msra.mxu0 %v3134_v41  ;;  %1800 = vmatpush1.bf16.msra.mxu1 %v3137_v42 }
  0x95   :  { %1462 = vmatprep.subr.bf16.mxu0 %v3145_v43  ;;  %1801 = vmatprep.subr.bf16.mxu1 %v3148_v44 }
  0x98   :  { %1463 = vmatpush1.bf16.msra.mxu0 %v3143_v45  ;;  %1802 = vmatpush1.bf16.msra.mxu1 %v3146_v46 }
  0x99   :  { %1464 = vmatprep.subr.bf16.mxu0 %v3156_v47  ;;  %1803 = vmatprep.subr.bf16.mxu1 %v3159_v48 }
  0x9a   :  { %1402 = vmatmul.mubr.bf16.gmra.mrb[12].mxu0 %v3124_v49  ;;  %1741 = vmatmul.mubr.bf16.gmra.mrb[12].mxu1 %v3124_v49 }
  0x9b   :  { %1411 = vmatprep.mubr.bf16.mxu0 %v3131_v50  ;;  %1750 = vmatprep.mubr.bf16.mxu1 %v3131_v50 }
  0x9c   :  { %1465 = vmatpush1.bf16.msra.mxu0 %v3154_v51  ;;  %1804 = vmatpush1.bf16.msra.mxu1 %v3157_v52 }
  0xa2   :  { %1412 = vmatmul.mubr.bf16.gmra.mrb[16].mxu0 %v3133_v53  ;;  %1751 = vmatmul.mubr.bf16.gmra.mrb[16].mxu1 %v3133_v53 }
  0xa3   :  { %1421 = vmatprep.mubr.bf16.mxu0 %v3140_v54  ;;  %1760 = vmatprep.mubr.bf16.mxu1 %v3140_v54 }
  0xaa   :  { %1422 = vmatmul.mubr.bf16.gmra.mrb[20].mxu0 %v3142_v55  ;;  %1761 = vmatmul.mubr.bf16.gmra.mrb[20].mxu1 %v3142_v55 }
  0xab   :  { %1431 = vmatprep.mubr.bf16.mxu0 %v3149_v56  ;;  %1770 = vmatprep.mubr.bf16.mxu1 %v3149_v56 }
  0xb2   :  { %1432 = vmatmul.mubr.bf16.gmra.mrb[24].mxu0 %v3151_v57  ;;  %1771 = vmatmul.mubr.bf16.gmra.mrb[24].mxu1 %v3151_v57 }
  0xb3   :  { %1441 = vmatprep.mubr.bf16.mxu0 %v3152_v58  ;;  %1780 = vmatprep.mubr.bf16.mxu1 %v3152_v58 }
  0xba   :  { %1442 = vmatmul.mubr.bf16.gmra.mrb[28].mxu0 %v3160_v59  ;;  %1781 = vmatmul.mubr.bf16.gmra.mrb[28].mxu1 %v3160_v59 }
  0xbb   :  { %1484 = vmatprep.mubr.bf16.mxu0 %v3425_v60  ;;  %1823 = vmatprep.mubr.bf16.mxu1 %v3425_v60 }
  0xc2   :  { %2670 = vmatmul.mubr.msk.bf16.vlgmr.msra.gmra.mrb[0].mxu0 %vm1201_vm0, %v3161_v61  ;;  %2678 = vmatmul.mubr.msk.bf16.vlgmr.msra.gmra.mrb[0].mxu1 %vm1201_vm0, %v3161_v61 }
  0xc3   :  { %1494 = vmatprep.mubr.bf16.mxu0 %v3425_v60  ;;  %1833 = vmatprep.mubr.bf16.mxu1 %v3425_v60 }
  0xca   :  { %2671 = vmatmul.mubr.msk.bf16.gmra.mrb[4].mxu0 %vm1201_vm0, %v3162_v62  ;;  %2679 = vmatmul.mubr.msk.bf16.gmra.mrb[4].mxu1 %vm1201_vm0, %v3162_v62 }
  0xcb   :  { %1504 = vmatprep.mubr.bf16.mxu0 %v3425_v60  ;;  %1843 = vmatprep.mubr.bf16.mxu1 %v3425_v60 }
  0xd2   :  { %2672 = vmatmul.mubr.msk.bf16.gmra.mrb[8].mxu0 %vm1201_vm0, %v3163_v63  ;;  %2680 = vmatmul.mubr.msk.bf16.gmra.mrb[8].mxu1 %vm1201_vm0, %v3163_v63 }
  0xd3   :  { %1514 = vmatprep.mubr.bf16.mxu0 %v3425_v60  ;;  %1853 = vmatprep.mubr.bf16.mxu1 %v3425_v60 }
  0xda   :  { %2673 = vmatmul.mubr.msk.bf16.gmra.mrb[12].mxu0 %vm1201_vm0, %v3164_v0  ;;  %2681 = vmatmul.mubr.msk.bf16.gmra.mrb[12].mxu1 %vm1201_vm0, %v3164_v0 }
  0xdb   :  { %1524 = vmatprep.mubr.bf16.mxu0 %v3425_v60  ;;  %1863 = vmatprep.mubr.bf16.mxu1 %v3425_v60 }
  0xe2   :  { %2674 = vmatmul.mubr.msk.bf16.gmra.mrb[16].mxu0 %vm1201_vm0, %v3165_v1  ;;  %2682 = vmatmul.mubr.msk.bf16.gmra.mrb[16].mxu1 %vm1201_vm0, %v3165_v1 }
  0xe3   :  { %1534 = vmatprep.mubr.bf16.mxu0 %v3425_v60  ;;  %1873 = vmatprep.mubr.bf16.mxu1 %v3425_v60 }
  0xea   :  { %2675 = vmatmul.mubr.msk.bf16.gmra.mrb[20].mxu0 %vm1201_vm0, %v3166_v2  ;;  %2683 = vmatmul.mubr.msk.bf16.gmra.mrb[20].mxu1 %vm1201_vm0, %v3166_v2 }
  0xeb   :  { %1544 = vmatprep.mubr.bf16.mxu0 %v3425_v60  ;;  %1883 = vmatprep.mubr.bf16.mxu1 %v3425_v60 }
  0xf2   :  { %2676 = vmatmul.mubr.msk.bf16.gmra.mrb[24].mxu0 %vm1201_vm0, %v3167_v3  ;;  %2684 = vmatmul.mubr.msk.bf16.gmra.mrb[24].mxu1 %vm1201_vm0, %v3167_v3 }
  0xf3   :  { %1554 = vmatprep.mubr.bf16.mxu0 %v3425_v60  ;;  %1893 = vmatprep.mubr.bf16.mxu1 %v3425_v60 }
  0xfa   :  { %2677 = vmatmul.mubr.msk.bf16.gmra.mrb[28].mxu0 %vm1201_vm0, %v3168_v4  ;;  %2685 = vmatmul.mubr.msk.bf16.gmra.mrb[28].mxu1 %vm1201_vm0, %v3168_v4 }
 0x195   :  { %v1486_v5 = vpop.f32.mrb[0].mxu0  ;;  %v1825_v6 = vpop.f32.mrb[0].mxu1 }
 0x196   :  { %v2686_v7 = vmul.f32 -1.442695, %v1486_v5  ;;  %v2688_v8 = vmul.f32 -1.442695, %v1825_v6  ;;  %v1488_v9 = vpop.f32.mrb[1].mxu0  ;;  %v1827_v10 = vpop.f32.mrb[1].mxu1 }
 0x197   :  { %v2687_v11 = vmul.f32 -1.442695, %v1488_v9  ;;  %v2689_v12 = vmul.f32 -1.442695, %v1827_v10  ;;  %v1490_v13 = vpop.f32.mrb[2].mxu0  ;;  %v1829_v14 = vpop.f32.mrb[2].mxu1 }
 0x198   :  { %3169 = vpow2.f32 %v2686_v7  ;;  %v2690_v15 = vmul.f32 -1.442695, %v1490_v13  ;;  %v1492_v16 = vpop.f32.mrb[3].mxu0  ;;  %v1831_v17 = vpop.f32.mrb[3].mxu1  ;;  %v2692_v18 = vmul.f32 -1.442695, %v1829_v14 }
 0x199   :  { %3171 = vpow2.f32 %v2688_v8  ;;  %v2691_v19 = vmul.f32 -1.442695, %v1492_v16  ;;  %v2693_v20 = vmul.f32 -1.442695, %v1831_v17 }
 0x19a   :  { %3173 = vpow2.f32 %v2687_v11 }
 0x19b   :  { %3175 = vpow2.f32 %v2689_v12 }
 0x19c   :  { %3177 = vpow2.f32 %v2690_v15 }
 0x19d   :  { %3179 = vpow2.f32 %v2692_v18  ;;  %v1496_v21 = vpop.f32.mrb[4].mxu0  ;;  %v1835_v22 = vpop.f32.mrb[4].mxu1 }
 0x19e   :  { %3181 = vpow2.f32 %v2691_v19  ;;  %v2694_v23 = vmul.f32 -1.442695, %v1496_v21  ;;  %v2696_v24 = vmul.f32 -1.442695, %v1835_v22  ;;  %v1498_v25 = vpop.f32.mrb[5].mxu0  ;;  %v1837_v26 = vpop.f32.mrb[5].mxu1 }
 0x19f   :  { %3183 = vpow2.f32 %v2693_v20  ;;  %v2695_v27 = vmul.f32 -1.442695, %v1498_v25  ;;  %v2697_v28 = vmul.f32 -1.442695, %v1837_v26  ;;  %v1500_v29 = vpop.f32.mrb[6].mxu0  ;;  %v4055_v30 = vpop.f32.mrb[6].mxu1 }
 0x1a0   :  { %3185 = vpow2.f32 %v2694_v23  ;;  %v4057_v31 = vpop.f32.mrb[7].mxu0  ;;  %v4059_v32 = vpop.f32.mrb[7].mxu1  ;;  %v2698_v36 = vmul.f32 -1.442695, %v1500_v29 }
 0x1a1   :  { %3187 = vpow2.f32 %v2696_v24 }
 0x1a2   :  { %v3170_v33 = vpop.eup %3169  ;;  %3189 = vpow2.f32 %v2695_v27 }
 0x1a3   :  { %v3172_v34 = vpop.eup %3171  ;;  %3191 = vpow2.f32 %v2697_v28  ;;  %v2032_v38 = vadd.f32 1.0, %v3170_v33 }
 0x1a4   :  { %v3174_v35 = vpop.eup %3173  ;;  %v2034_v42 = vadd.f32 1.0, %v3172_v34  ;;  %3193 = vpow2.f32 %v2698_v36 }
 0x1a5   :  { %v3176_v37 = vpop.eup %3175  ;;  %v1506_v39 = vpop.f32.mrb[8].mxu0  ;;  %v2033_v45 = vadd.f32 1.0, %v3174_v35  ;;  %3195 = vrcp.f32 %v2032_v38 }
 0x1a6   :  { %v1845_v40 = vpop.f32.mrb[8].mxu1  ;;  %v3178_v41 = vpop.eup %3177  ;;  %v2035_v49 = vadd.f32 1.0, %v3176_v37  ;;  %3197 = vrcp.f32 %v2034_v42  ;;  %v2702_v9 = vmul.f32 -1.442695, %v1506_v39 }
 0x1a7   :  { %v1508_v43 = vpop.f32.mrb[9].mxu0  ;;  %v3180_v44 = vpop.eup %3179  ;;  %v2036_v52 = vadd.f32 1.0, %v3178_v41  ;;  %3199 = vrcp.f32 %v2033_v45  ;;  %v2704_v12 = vmul.f32 -1.442695, %v1845_v40  ;;  %v2700_v41 = vmul.f32 -1.442695, %v4055_v30 }
 0x1a8   :  { %v1847_v46 = vpop.f32.mrb[9].mxu1  ;;  %v1510_v47 = vpop.f32.mrb[10].mxu0  ;;  %v2038_v56 = vadd.f32 1.0, %v3180_v44  ;;  %3201 = vrcp.f32 %v2035_v49  ;;  %v2703_v14 = vmul.f32 -1.442695, %v1508_v43 }
 0x1a9   :  { %v3182_v48 = vpop.eup %3181  ;;  %v1849_v50 = vpop.f32.mrb[10].mxu1  ;;  %3203 = vrcp.f32 %v2036_v52  ;;  %v2705_v16 = vmul.f32 -1.442695, %v1847_v46  ;;  %v2706_v18 = vmul.f32 -1.442695, %v1510_v47 }
 0x1aa   :  { %v3184_v51 = vpop.eup %3183  ;;  %v1512_v53 = vpop.f32.mrb[11].mxu0  ;;  %v2037_v58 = vadd.f32 1.0, %v3182_v48  ;;  %3205 = vrcp.f32 %v2038_v56  ;;  %v2708_v22 = vmul.f32 -1.442695, %v1849_v50  ;;  %v2699_v43 = vmul.f32 -1.442695, %v4057_v31 }
 0x1ab   :  { %v1851_v54 = vpop.f32.mrb[11].mxu1  ;;  %v3186_v55 = vpop.eup %3185  ;;  %v2039_v60 = vadd.f32 1.0, %v3184_v51  ;;  %v2707_v26 = vmul.f32 -1.442695, %v1512_v53  ;;  %v2701_v45 = vmul.f32 -1.442695, %v4059_v32 }
 0x1ac   :  { %v3188_v57 = vpop.eup %3187  ;;  %v2040_v62 = vadd.f32 1.0, %v3186_v55  ;;  %3207 = vrcp.f32 %v2037_v58  ;;  %v2709_v33 = vmul.f32 -1.442695, %v1851_v54 }
 0x1ad   :  { %v3190_v59 = vpop.eup %3189  ;;  %v1516_v63 = vpop.f32.mrb[12].mxu0  ;;  %v2042_v1 = vadd.f32 1.0, %v3188_v57  ;;  %3209 = vrcp.f32 %v2039_v60 }
 0x1ae   :  { %v3192_v61 = vpop.eup %3191  ;;  %v1855_v0 = vpop.f32.mrb[12].mxu1  ;;  %v2041_v3 = vadd.f32 1.0, %v3190_v59  ;;  %3211 = vrcp.f32 %v2040_v62  ;;  %v2710_v37 = vmul.f32 -1.442695, %v1516_v63 }
 0x1af   :  { %v4061_v2 = vpop.f32.mrb[13].mxu0  ;;  %v4063_v4 = vpop.f32.mrb[13].mxu1  ;;  %v2043_v6 = vadd.f32 1.0, %v3192_v61  ;;  %3213 = vrcp.f32 %v2042_v1  ;;  %v2712_v39 = vmul.f32 -1.442695, %v1855_v0 }
 0x1b0   :  { %v4065_v5 = vpop.f32.mrb[14].mxu0  ;;  %v4067_v7 = vpop.f32.mrb[14].mxu1  ;;  %3215 = vrcp.f32 %v2041_v3 }
 0x1b1   :  { %v4069_v8 = vpop.f32.mrb[15].mxu0  ;;  %v4071_v10 = vpop.f32.mrb[15].mxu1  ;;  %3217 = vrcp.f32 %v2043_v6 }
 0x1b2   :  { %v4073_v11 = vpop.eup %3193  ;;  %3219 = vpow2.f32 %v2702_v9 }
 0x1b3   :  { %v4075_v13 = vpop.eup %3195  ;;  %3221 = vpow2.f32 %v2704_v12 }
 0x1b4   :  { %v4077_v15 = vpop.eup %3197  ;;  %3223 = vpow2.f32 %v2703_v14 }
 0x1b5   :  { %v4079_v17 = vpop.eup %3199  ;;  %v4081_v19 = vpop.f32.mrb[16].mxu0  ;;  %3225 = vpow2.f32 %v2705_v16 }
 0x1b6   :  { %v4083_v20 = vpop.f32.mrb[16].mxu1  ;;  %v4085_v21 = vpop.eup %3201  ;;  %3227 = vpow2.f32 %v2706_v18 }
 0x1b7   :  { %v4087_v23 = vpop.f32.mrb[17].mxu0  ;;  %v4089_v24 = vpop.f32.mrb[17].mxu1  ;;  %3229 = vpow2.f32 %v2708_v22 }
 0x1b8   :  { %v4091_v25 = vpop.eup %3203  ;;  %v4093_v27 = vpop.f32.mrb[18].mxu0  ;;  %3231 = vpow2.f32 %v2707_v26 }
 0x1b9   :  { %v4095_v28 = vpop.f32.mrb[18].mxu1  ;;  %v4097_v29 = vpop.eup %3205  ;;  %3233 = vpow2.f32 %v2709_v33 }
 0x1ba   :  { %v4099_v34 = vpop.f32.mrb[19].mxu0  ;;  %v4101_v35 = vpop.f32.mrb[19].mxu1  ;;  %3235 = vpow2.f32 %v2710_v37 }
 0x1bb   :  { %v4103_v36 = vpop.eup %3207  ;;  %3237 = vpow2.f32 %v2712_v39  ;;  %v2711_v39 = vmul.f32 -1.442695, %v4061_v2  ;;  %v2716_v2 = vmul.f32 -1.442695, %v4067_v7 }
 0x1bc   :  { %4456 = vst [vmem:[#allocation3_spill] sm:$0xff] %v4103_v36  ;;  %v4105_v38 = vpop.eup %3209  ;;  %3239 = vpow2.f32 %v2700_v41 }
 0x1bd   :  { %4457 = vst [vmem:[#allocation4_spill] sm:$0xff] %v4105_v38  ;;  %v4107_v40 = vpop.eup %3211  ;;  %v4116_v46 = vpop.f32.mrb[20].mxu0  ;;  %3241 = vpow2.f32 %v2699_v43 }
 0x1be   :  { %4458 = vst [vmem:[#allocation5_spill] sm:$0xff] %v4107_v40  ;;  %v4110_v42 = vpop.eup %3213  ;;  %v4118_v47 = vpop.f32.mrb[20].mxu1  ;;  %3243 = vpow2.f32 %v2701_v45 }
 0x1bf   :  { %4459 = vst [vmem:[#allocation6_spill] sm:$0xff] %v4110_v42  ;;  %v4113_v44 = vpop.eup %3215  ;;  %v4122_v49 = vpop.f32.mrb[21].mxu0 }
 0x1c0   :  { %4460 = vst [vmem:[#allocation7_spill] sm:$0xff] %v4113_v44  ;;  %v4120_v48 = vpop.eup %3217  ;;  %v4124_v50 = vpop.f32.mrb[21].mxu1 }
 0x1c1   :  { %4461 = vst [vmem:[#allocation8_spill] sm:$0xff] %v4120_v48  ;;  %v3220_v30 = vpop.eup %3219  ;;  %v4126_v31 = vpop.f32.mrb[22].mxu0 }
 0x1c2   :  { %v3222_v51 = vpop.eup %3221  ;;  %v2144_v52 = vadd.f32 1.0, %v3220_v30  ;;  %v4128_v32 = vpop.f32.mrb[22].mxu1 }
 0x1c3   :  { %v3224_v53 = vpop.eup %3223  ;;  %v2146_v54 = vadd.f32 1.0, %v3222_v51  ;;  %v4130_v55 = vpop.f32.mrb[23].mxu0  ;;  %v2713_v51 = vmul.f32 -1.442695, %v4063_v4  ;;  %v2717_v4 = vmul.f32 -1.442695, %v4071_v10 }
 0x1c4   :  { %v4132_v56 = vpop.f32.mrb[23].mxu1  ;;  %v3226_v57 = vpop.eup %3225  ;;  %3245 = vrcp.f32 %v2144_v52  ;;  %v2145_v58 = vadd.f32 1.0, %v3224_v53  ;;  %v2714_v53 = vmul.f32 -1.442695, %v4065_v5 }
 0x1c5   :  { %v3228_v59 = vpop.eup %3227  ;;  %3247 = vrcp.f32 %v2146_v54  ;;  %v2147_v60 = vadd.f32 1.0, %v3226_v57  ;;  %v4134_v1 = vpop.f32.mrb[24].mxu0 }
 0x1c6   :  { %v3230_v61 = vpop.eup %3229  ;;  %3249 = vrcp.f32 %v2145_v58  ;;  %v2148_v62 = vadd.f32 1.0, %v3228_v59  ;;  %v4136_v3 = vpop.f32.mrb[24].mxu1  ;;  %v2715_v58 = vmul.f32 -1.442695, %v4069_v8  ;;  %v2720_v8 = vmul.f32 -1.442695, %v4083_v20 }
 0x1c7   :  { %v3232_v63 = vpop.eup %3231  ;;  %3251 = vrcp.f32 %v2147_v60  ;;  %v2150_v0 = vadd.f32 1.0, %v3230_v61  ;;  %v4138_v12 = vpop.f32.mrb[25].mxu0  ;;  %v2722_v20 = vmul.f32 -1.442695, %v4093_v27 }
 0x1c8   :  { %v3234_v6 = vpop.eup %3233  ;;  %3253 = vrcp.f32 %v2148_v62  ;;  %v2149_v9 = vadd.f32 1.0, %v3232_v63  ;;  %v4140_v14 = vpop.f32.mrb[25].mxu1  ;;  %v2718_v62 = vmul.f32 -1.442695, %v4081_v19 }
 0x1c9   :  { %v3236_v16 = vpop.eup %3235  ;;  %3255 = vrcp.f32 %v2150_v0  ;;  %v2151_v18 = vadd.f32 1.0, %v3234_v6  ;;  %v4142_v22 = vpop.f32.mrb[26].mxu0 }
 0x1ca   :  { %v4144_v26 = vpop.f32.mrb[26].mxu1  ;;  %v3238_v33 = vpop.eup %3237  ;;  %3257 = vrcp.f32 %v2149_v9  ;;  %v2152_v37 = vadd.f32 1.0, %v3236_v16  ;;  %v2719_v16 = vmul.f32 -1.442695, %v4087_v23 }
 0x1cb   :  { %v4147_v41 = vpop.f32.mrb[27].mxu0  ;;  %v4149_v43 = vpop.f32.mrb[27].mxu1  ;;  %3259 = vrcp.f32 %v2151_v18  ;;  %v2154_v30 = vadd.f32 1.0, %v3238_v33 }
 0x1cc   :  { %v4151_v45 = vpop.eup %3239  ;;  %3261 = vrcp.f32 %v2152_v37  ;;  %v2721_v37 = vmul.f32 -1.442695, %v4089_v24 }
 0x1cd   :  { %v4154_v52 = vpop.eup %3241  ;;  %3263 = vrcp.f32 %v2154_v30  ;;  %v4166_v60 = vpop.f32.mrb[28].mxu0 }
 0x1ce   :  { %v4157_v54 = vpop.eup %3243  ;;  %3265 = vpow2.f32 %v2711_v39  ;;  %v4168_v61 = vpop.f32.mrb[28].mxu1 }
 0x1cf   :  { %v4160_v57 = vpop.eup %3245  ;;  %3267 = vpow2.f32 %v2713_v51  ;;  %v4173_v7 = vpop.f32.mrb[29].mxu0  ;;  %v2724_v51 = vmul.f32 -1.442695, %v4095_v28 }
 0x1d0   :  { %v4163_v59 = vpop.eup %3247  ;;  %3269 = vpow2.f32 %v2714_v53  ;;  %v4175_v63 = vpop.f32.mrb[29].mxu1  ;;  %v2723_v53 = vmul.f32 -1.442695, %v4099_v34 }
 0x1d1   :  { %v4170_v5 = vpop.eup %3249  ;;  %3271 = vpow2.f32 %v2716_v2  ;;  %v4180_v6 = vpop.f32.mrb[30].mxu0 }
 0x1d2   :  { %v4177_v0 = vpop.eup %3251  ;;  %v4182_v10 = vpop.f32.mrb[30].mxu1  ;;  %3273 = vpow2.f32 %v2715_v58 }
 0x1d3   :  { %v4184_v9 = vpop.eup %3253  ;;  %v4187_v18 = vpop.f32.mrb[31].mxu0  ;;  %3275 = vpow2.f32 %v2717_v4 }
 0x1d4   :  { %v4189_v19 = vpop.f32.mrb[31].mxu1  ;;  %v4191_v33 = vpop.eup %3255  ;;  %3277 = vpow2.f32 %v2718_v62 }
 0x1d5   :  { %v4194_v39 = vpop.eup %3257  ;;  %3279 = vpow2.f32 %v2720_v8 }
 0x1d6   :  { %v4197_v30 = vpop.eup %3259  ;;  %3281 = vpow2.f32 %v2719_v16 }
 0x1d7   :  { %v4200_v23 = vpop.eup %3261  ;;  %3283 = vpow2.f32 %v2721_v37 }
 0x1d8   :  { %v4203_v2 = vpop.eup %3263  ;;  %3285 = vpow2.f32 %v2722_v20 }
 0x1d9   :  { %v3266_v58 = vpop.eup %3265  ;;  %3287 = vpow2.f32 %v2724_v51 }
 0x1da   :  { %v3268_v24 = vpop.eup %3267  ;;  %v2153_v4 = vadd.f32 1.0, %v3266_v58  ;;  %3289 = vpow2.f32 %v2723_v53 }
 0x1db   :  { %v3270_v62 = vpop.eup %3269  ;;  %v2155_v27 = vadd.f32 1.0, %v3268_v24 }
 0x1dc   :  { %v3272_v48 = vpop.eup %3271  ;;  %3291 = vrcp.f32 %v2153_v4  ;;  %v2156_v8 = vadd.f32 1.0, %v3270_v62 }
 0x1dd   :  { %v3274_v28 = vpop.eup %3273  ;;  %3293 = vrcp.f32 %v2155_v27  ;;  %v2158_v44 = vadd.f32 1.0, %v3272_v48 }
 0x1de   :  { %v3276_v16 = vpop.eup %3275  ;;  %3295 = vrcp.f32 %v2156_v8  ;;  %v2157_v34 = vadd.f32 1.0, %v3274_v28 }
 0x1df   :  { %v3278_v42 = vpop.eup %3277  ;;  %3297 = vrcp.f32 %v2158_v44  ;;  %v2159_v37 = vadd.f32 1.0, %v3276_v16  ;;  %v2725_v44 = vmul.f32 -1.442695, %v4101_v35  ;;  %v2729_v35 = vmul.f32 -1.442695, %v4124_v50 }
 0x1e0   :  { %v3280_v40 = vpop.eup %3279  ;;  %3299 = vrcp.f32 %v2157_v34  ;;  %v2256_v20 = vadd.f32 1.0, %v3278_v42 }
 0x1e1   :  { %v3282_v58 = vpop.eup %3281  ;;  %3301 = vrcp.f32 %v2159_v37  ;;  %v2258_v51 = vadd.f32 1.0, %v3280_v40  ;;  %v2726_v40 = vmul.f32 -1.442695, %v4116_v46  ;;  %v2728_v37 = vmul.f32 -1.442695, %v4118_v47 }
 0x1e2   :  { %v3284_v24 = vpop.eup %3283  ;;  %3303 = vrcp.f32 %v2256_v20  ;;  %v2257_v53 = vadd.f32 1.0, %v3282_v58  ;;  %v2727_v58 = vmul.f32 -1.442695, %v4122_v49  ;;  %v2730_v46 = vmul.f32 -1.442695, %v4126_v31 }
 0x1e3   :  { %v3286_v4 = vpop.eup %3285  ;;  %3305 = vrcp.f32 %v2258_v51  ;;  %v2259_v62 = vadd.f32 1.0, %v3284_v24  ;;  %v2732_v47 = vmul.f32 -1.442695, %v4128_v32 }
 0x1e4   :  { %v3288_v27 = vpop.eup %3287  ;;  %3307 = vrcp.f32 %v2257_v53  ;;  %v2260_v48 = vadd.f32 1.0, %v3286_v4 }
 0x1e5   :  { %v3290_v8 = vpop.eup %3289  ;;  %3309 = vrcp.f32 %v2259_v62  ;;  %v2262_v28 = vadd.f32 1.0, %v3288_v27  ;;  %v2731_v62 = vmul.f32 -1.442695, %v4130_v55  ;;  %v2733_v27 = vmul.f32 -1.442695, %v4132_v56 }
 0x1e6   :  { %v4206_v16 = vpop.eup %3291  ;;  %3311 = vrcp.f32 %v2260_v48  ;;  %v2261_v42 = vadd.f32 1.0, %v3290_v8 }
 0x1e7   :  { %v4209_v34 = vpop.eup %3293  ;;  %3313 = vrcp.f32 %v2262_v28 }
 0x1e8   :  { %v4212_v20 = vpop.eup %3295  ;;  %3315 = vrcp.f32 %v2261_v42 }
 0x1e9   :  { %v4215_v51 = vpop.eup %3297  ;;  %3317 = vpow2.f32 %v2725_v44 }
 0x1ea   :  { %v4218_v24 = vpop.eup %3299  ;;  %3319 = vpow2.f32 %v2726_v40 }
 0x1eb   :  { %v4221_v53 = vpop.eup %3301  ;;  %3321 = vpow2.f32 %v2728_v37 }
 0x1ec   :  { %4462 = vst [vmem:[#allocation9_spill] sm:$0xff] %v4221_v53  ;;  %v3304_v4 = vpop.eup %3303  ;;  %3323 = vpow2.f32 %v2727_v58 }
 0x1ed   :  { %v3306_v49 = vpop.eup %3305  ;;  %3325 = vpow2.f32 %v2729_v35 }
 0x1ee   :  { %v3308_v48 = vpop.eup %3307  ;;  %3327 = vpow2.f32 %v2730_v46 }
 0x1ef   :  { %v3310_v50 = vpop.eup %3309  ;;  %3329 = vpow2.f32 %v2732_v47 }
 0x1f0   :  { %v4226_v8 = vpop.eup %3311  ;;  %3331 = vpow2.f32 %v2731_v62 }
 0x1f1   :  { %v4228_v31 = vpop.eup %3313  ;;  %3333 = vpow2.f32 %v2733_v27  ;;  %v2337_v27 = vld [vmem:[%s4453_s2 + $0x8] sm:$0xff] }
 0x1f2   :  { %v4230_v28 = vpop.eup %3315  ;;  %3335 = vtanh.f32 %v4134_v1  ;;  %v2336_v1 = vld [vmem:[%s4453_s2] sm:$0xff] }
 0x1f3   :  { %v3318_v32 = vpop.eup %3317  ;;  %3337 = vtanh.f32 %v4136_v3 }
 0x1f4   :  { %v3320_v55 = vpop.eup %3319  ;;  %v2263_v44 = vadd.f32 1.0, %v3318_v32  ;;  %3339 = vtanh.f32 %v4138_v12  ;;  %v2338_v12 = vld [vmem:[%s4453_s2 + $0x10] sm:$0xff] }
 0x1f5   :  { %v3322_v56 = vpop.eup %3321  ;;  %v2264_v42 = vadd.f32 1.0, %v3320_v55  ;;  %3341 = vtanh.f32 %v4140_v14 }
 0x1f6   :  { %v3324_v40 = vpop.eup %3323  ;;  %3343 = vrcp.f32 %v2263_v44  ;;  %v2266_v37 = vadd.f32 1.0, %v3322_v56  ;;  %v2352_v44 = vmul.f32 %v3304_v4, %v2336_v1  ;;  %v2339_v56 = vld [vmem:[%s4453_s2 + $0x18] sm:$0xff] }
 0x1f7   :  { %v3326_v58 = vpop.eup %3325  ;;  %3345 = vrcp.f32 %v2264_v42  ;;  %v2265_v35 = vadd.f32 1.0, %v3324_v40 }
 0x1f8   :  { %v3328_v46 = vpop.eup %3327  ;;  %3347 = vrcp.f32 %v2266_v37  ;;  %v2267_v3 = vadd.f32 1.0, %v3326_v58  ;;  %v2354_v37 = vmul.f32 %v3306_v49, %v2338_v12 }
 0x1f9   :  { %v3330_v47 = vpop.eup %3329  ;;  %3349 = vrcp.f32 %v2265_v35  ;;  %v2268_v14 = vadd.f32 1.0, %v3328_v46  ;;  %v2353_v46 = vmul.f32 %v3308_v48, %v2337_v27 }
 0x1fa   :  { %v3332_v62 = vpop.eup %3331  ;;  %3351 = vrcp.f32 %v2267_v3  ;;  %v2270_v32 = vadd.f32 1.0, %v3330_v47  ;;  %v2355_v3 = vmul.f32 %v3310_v50, %v2339_v56 }
 0x1fb   :  { %v3334_v55 = vpop.eup %3333  ;;  %3353 = vrcp.f32 %v2268_v14  ;;  %v2269_v42 = vadd.f32 1.0, %v3332_v62 }
 0x1fc   :  { %v3336_v40 = vpop.eup %3335  ;;  %3355 = vrcp.f32 %v2270_v32  ;;  %v2271_v58 = vadd.f32 1.0, %v3334_v55 }
 0x1fd   :  { %v3338_v35 = vpop.eup %3337  ;;  %3357 = vrcp.f32 %v2269_v42  ;;  %v2368_v38 = vmul.f32 %v3336_v40, %v4160_v57  ;;  %v2344_v42 = vld [vmem:[%s4453_s2 + $0x40] sm:$0xff] }
 0x1fe   :  { %v3340_v36 = vpop.eup %3339  ;;  %3359 = vrcp.f32 %v2271_v58  ;;  %v2370_v4 = vmul.f32 %v3338_v35, %v4163_v59 }
 0x1ff   :  { %v3342_v1 = vpop.eup %3341  ;;  %v2384_v47 = vadd.f32 %v2368_v38, %v2352_v44  ;;  %v2369_v53 = vmul.f32 %v3340_v36, %v4170_v5  ;;  %3361 = vtanh.f32 %v4142_v22  ;;  %v2340_v5 = vld [vmem:[%s4453_s2 + $0x20] sm:$0xff] }
 0x200   :  { %v3344_v14 = vpop.eup %3343  ;;  %v2386_v49 = vadd.f32 %v2370_v4, %v2354_v37  ;;  %v2371_v12 = vmul.f32 %v3342_v1, %v4177_v0  ;;  %3363 = vtanh.f32 %v4144_v26  ;;  %v2356_v27 = vmul.f32 %v4226_v8, %v2340_v5  ;;  %v2343_v8 = vld [vmem:[%s4453_s2 + $0x38] sm:$0xff]  ;;  %v2348_v4 = vld [vmem:[%s4453_s2 + $0x60] sm:$0xff] }
 0x201   :  { %v4254_v48 = vpop.eup %3345  ;;  %3365 = vtanh.f32 %v2384_v47  ;;  %2432 = vst [vmem:[%s4454_s4] sm:$0xff] %v2384_v47  ;;  %v2385_v57 = vadd.f32 %v2369_v53, %v2353_v46  ;;  %v2342_v53 = vld [vmem:[%s4453_s2 + $0x30] sm:$0xff]  ;;  %v2046_v37 = vadd.f32 1.0, %v4151_v45  ;;  %v2045_v45 = vadd.f32 1.0, %v4154_v52  ;;  %v2347_v52 = vld [vmem:[%s4453_s2 + $0x58] sm:$0xff] }
 0x202   :  { %v4259_v59 = vpop.eup %3347  ;;  %3367 = vtanh.f32 %v2386_v49  ;;  %2734 = vst [vmem:[%s4454_s4 + $0x40] sm:$0xff] %v2386_v49  ;;  %v2387_v36 = vadd.f32 %v2371_v12, %v2355_v3  ;;  %v2360_v35 = vmul.f32 %v4254_v48, %v2344_v42 }
 0x203   :  { %v4264_v38 = vpop.eup %3349  ;;  %3369 = vtanh.f32 %v2385_v57  ;;  %2433 = vst [vmem:[%s4454_s4 + $0x8] sm:$0xff] %v2385_v57 }
 0x204   :  { %v4269_v22 = vpop.eup %3351  ;;  %3371 = vtanh.f32 %v2387_v36  ;;  %2735 = vst [vmem:[%s4454_s4 + $0x48] sm:$0xff] %v2387_v36 }
 0x205   :  { %v4274_v26 = vpop.eup %3353  ;;  %3373 = vtanh.f32 %v4147_v41  ;;  %v2358_v41 = vmul.f32 %v4228_v31, %v2342_v53  ;;  %v2363_v48 = vmul.f32 %v4269_v22, %v2347_v52 }
 0x206   :  { %v4280_v0 = vpop.eup %3355  ;;  %3375 = vtanh.f32 %v4149_v43 }
 0x207   :  { %v4286_v50 = vpop.eup %3357  ;;  %3377 = vtanh.f32 %v4166_v60  ;;  %v2341_v60 = vld [vmem:[%s4453_s2 + $0x28] sm:$0xff] }
 0x208   :  { %v4289_v62 = vpop.eup %3359  ;;  %3379 = vtanh.f32 %v4168_v61 }
 0x209   :  { %v3362_v32 = vpop.eup %3361  ;;  %3381 = vtanh.f32 %v4173_v7 }
 0x20a   :  { %v3364_v55 = vpop.eup %3363  ;;  %v2372_v44 = vmul.f32 %v3362_v32, %v4184_v9  ;;  %3383 = vtanh.f32 %v4175_v63  ;;  %v2044_v9 = vadd.f32 1.0, %v4073_v11 }
 0x20b   :  { %v3366_v43 = vpop.eup %3365  ;;  %v2374_v56 = vmul.f32 %v3364_v55, %v4191_v33  ;;  %3385 = vtanh.f32 %v4180_v6 }
 0x20c   :  { %v3368_v61 = vpop.eup %3367  ;;  %v2416_v7 = vmul.f32 %v3366_v43, %v4075_v13  ;;  %v2388_v31 = vadd.f32 %v2372_v44, %v2356_v27  ;;  %3387 = vtanh.f32 %v4182_v10  ;;  %v2357_v13 = vmul.f32 %v4230_v28, %v2341_v60  ;;  %v2346_v10 = vld [vmem:[%s4453_s2 + $0x50] sm:$0xff]  ;;  %v2345_v28 = vld [vmem:[%s4453_s2 + $0x48] sm:$0xff] }
 0x20d   :  { %v3370_v63 = vpop.eup %3369  ;;  %v2418_v33 = vmul.f32 %v3368_v61, %v4077_v15  ;;  %v2390_v6 = vadd.f32 %v2374_v56, %v2358_v41  ;;  %3389 = vtanh.f32 %v4187_v18  ;;  %v2359_v18 = vmul.f32 %v3344_v14, %v2343_v8 }
 0x20e   :  { %v3372_v40 = vpop.eup %3371  ;;  %2440 = vst [vmem:[%s4455_s3] sm:$0xff] %v2416_v7  ;;  %v2417_v11 = vmul.f32 %v3370_v63, %v4079_v17  ;;  %3391 = vtanh.f32 %v2388_v31  ;;  %2434 = vst [vmem:[%s4454_s4 + $0x10] sm:$0xff] %v2388_v31  ;;  %v2362_v3 = vmul.f32 %v4259_v59, %v2346_v10  ;;  %v2047_v7 = vadd.f32 1.0, %v4157_v54 }
 0x20f   :  { %v3374_v15 = vpop.eup %3373  ;;  %2742 = vst [vmem:[%s4455_s3 + $0x40] sm:$0xff] %v2418_v33  ;;  %v2419_v58 = vmul.f32 %v3372_v40, %v4085_v21  ;;  %3393 = vtanh.f32 %v2390_v6  ;;  %2736 = vst [vmem:[%s4454_s4 + $0x50] sm:$0xff] %v2390_v6  ;;  %v4464_v6 = vld [vmem:[#allocation3_spill] sm:$0xff] }
 0x210   :  { %v3376_v17 = vpop.eup %3375  ;;  %2441 = vst [vmem:[%s4455_s3 + $0x8] sm:$0xff] %v2417_v11  ;;  %v2373_v46 = vmul.f32 %v3374_v15, %v4194_v39  ;;  %3395 = vtanh.f32 %v4189_v19  ;;  %v2361_v39 = vmul.f32 %v4264_v38, %v2345_v28  ;;  %v2350_v19 = vld [vmem:[%s4453_s2 + $0x70] sm:$0xff]  ;;  %v2364_v38 = vmul.f32 %v4274_v26, %v2348_v4  ;;  %v4467_v28 = vld [vmem:[#allocation6_spill] sm:$0xff] }
 0x211   :  { %v3378_v21 = vpop.eup %3377  ;;  %3397 = vrcp.f32 %v2044_v9  ;;  %2743 = vst [vmem:[%s4455_s3 + $0x48] sm:$0xff] %v2419_v58  ;;  %v2375_v1 = vmul.f32 %v3376_v17, %v4197_v30  ;;  %v2349_v30 = vld [vmem:[%s4453_s2 + $0x68] sm:$0xff]  ;;  %v2366_v22 = vmul.f32 %v4280_v0, %v2350_v19  ;;  %v2351_v0 = vld [vmem:[%s4453_s2 + $0x78] sm:$0xff]  ;;  %v4466_v15 = vld [vmem:[#allocation5_spill] sm:$0xff] }
 0x212   :  { %v3380_v47 = vpop.eup %3379  ;;  %3399 = vrcp.f32 %v2046_v37  ;;  %v2389_v14 = vadd.f32 %v2373_v46, %v2357_v13  ;;  %v2376_v49 = vmul.f32 %v3378_v21, %v4200_v23  ;;  %v2365_v41 = vmul.f32 %v4286_v50, %v2349_v30  ;;  %v4465_v13 = vld [vmem:[#allocation4_spill] sm:$0xff] }
 0x213   :  { %v3382_v12 = vpop.eup %3381  ;;  %3401 = vrcp.f32 %v2045_v45  ;;  %v2391_v57 = vadd.f32 %v2375_v1, %v2359_v18  ;;  %v2378_v59 = vmul.f32 %v3380_v47, %v4203_v2  ;;  %v4469_v21 = vld [vmem:[#allocation8_spill] sm:$0xff] }
 0x214   :  { %v3384_v36 = vpop.eup %3383  ;;  %3403 = vtanh.f32 %v2389_v14  ;;  %2435 = vst [vmem:[%s4454_s4 + $0x18] sm:$0xff] %v2389_v14  ;;  %v2392_v23 = vadd.f32 %v2376_v49, %v2360_v35  ;;  %v2377_v5 = vmul.f32 %v3382_v12, %v4206_v16  ;;  %v4468_v35 = vld [vmem:[#allocation7_spill] sm:$0xff] }
 0x215   :  { %v3386_v53 = vpop.eup %3385  ;;  %3405 = vtanh.f32 %v2391_v57  ;;  %2737 = vst [vmem:[%s4454_s4 + $0x58] sm:$0xff] %v2391_v57  ;;  %v2394_v2 = vadd.f32 %v2378_v59, %v2362_v3  ;;  %v2379_v27 = vmul.f32 %v3384_v36, %v4209_v34 }
 0x216   :  { %v3388_v26 = vpop.eup %3387  ;;  %3407 = vtanh.f32 %v2392_v23  ;;  %2436 = vst [vmem:[%s4454_s4 + $0x20] sm:$0xff] %v2392_v23  ;;  %v2393_v32 = vadd.f32 %v2377_v5, %v2361_v39  ;;  %v2380_v16 = vmul.f32 %v3386_v53, %v4212_v20 }
 0x217   :  { %v3390_v55 = vpop.eup %3389  ;;  %3409 = vtanh.f32 %v2394_v2  ;;  %2738 = vst [vmem:[%s4454_s4 + $0x60] sm:$0xff] %v2394_v2  ;;  %v2395_v34 = vadd.f32 %v2379_v27, %v2363_v48  ;;  %v2382_v44 = vmul.f32 %v3388_v26, %v4215_v51  ;;  %v2367_v51 = vmul.f32 %v4289_v62, %v2351_v0  ;;  %v4463_v62 = vld [vmem:[#allocation9_spill] sm:$0xff] }
 0x218   :  { %v3392_v43 = vpop.eup %3391  ;;  %3411 = vtanh.f32 %v2393_v32  ;;  %2437 = vst [vmem:[%s4454_s4 + $0x28] sm:$0xff] %v2393_v32  ;;  %v2396_v20 = vadd.f32 %v2380_v16, %v2364_v38  ;;  %v2381_v50 = vmul.f32 %v3390_v55, %v4218_v24 }
 0x219   :  { %v3394_v60 = vpop.eup %3393  ;;  %v2420_v56 = vmul.f32 %v3392_v43, %v4091_v25  ;;  %3413 = vtanh.f32 %v2395_v34  ;;  %2739 = vst [vmem:[%s4454_s4 + $0x68] sm:$0xff] %v2395_v34  ;;  %v2398_v61 = vadd.f32 %v2382_v44, %v2366_v22 }
 0x21a   :  { %v3396_v8 = vpop.eup %3395  ;;  %v2422_v31 = vmul.f32 %v3394_v60, %v4097_v29  ;;  %3415 = vtanh.f32 %v2396_v20  ;;  %2438 = vst [vmem:[%s4454_s4 + $0x30] sm:$0xff] %v2396_v20  ;;  %v2397_v24 = vadd.f32 %v2381_v50, %v2365_v41 }
 0x21b   :  { %v3398_v25 = vpop.eup %3397  ;;  %2442 = vst [vmem:[%s4455_s3 + $0x10] sm:$0xff] %v2420_v56  ;;  %3417 = vtanh.f32 %v2398_v61  ;;  %2740 = vst [vmem:[%s4454_s4 + $0x70] sm:$0xff] %v2398_v61  ;;  %v2383_v54 = vmul.f32 %v3396_v8, %v4463_v62 }
 0x21c   :  { %v3400_v63 = vpop.eup %3399  ;;  %2744 = vst [vmem:[%s4455_s3 + $0x50] sm:$0xff] %v2422_v31  ;;  %3419 = vtanh.f32 %v2397_v24  ;;  %2439 = vst [vmem:[%s4454_s4 + $0x38] sm:$0xff] %v2397_v24 }
 0x21d   :  { %v3402_v29 = vpop.eup %3401  ;;  %v2399_v9 = vadd.f32 %v2383_v54, %v2367_v51  ;;  %3421 = vrcp.f32 %v2047_v7 }
 0x21e   :  { %v3404_v42 = vpop.eup %3403 }
 0x21f   :  { %v3406_v33 = vpop.eup %3405  ;;  %v2421_v40 = vmul.f32 %v3404_v42, %v4464_v6  ;;  %3423 = vtanh.f32 %v2399_v9  ;;  %2741 = vst [vmem:[%s4454_s4 + $0x78] sm:$0xff] %v2399_v9 }
 0x220   :  { %v3408_v37 = vpop.eup %3407  ;;  %v2423_v10 = vmul.f32 %v3406_v33, %v4465_v13 }
 0x221   :  { %v3410_v11 = vpop.eup %3409  ;;  %2443 = vst [vmem:[%s4455_s3 + $0x18] sm:$0xff] %v2421_v40  ;;  %v2424_v45 = vmul.f32 %v3408_v37, %v4466_v15 }
 0x222   :  { %v3412_v18 = vpop.eup %3411  ;;  %2745 = vst [vmem:[%s4455_s3 + $0x58] sm:$0xff] %v2423_v10  ;;  %v2426_v58 = vmul.f32 %v3410_v11, %v4467_v28 }
 0x223   :  { %v3414_v17 = vpop.eup %3413  ;;  %2444 = vst [vmem:[%s4455_s3 + $0x20] sm:$0xff] %v2424_v45  ;;  %v2425_v52 = vmul.f32 %v3412_v18, %v4468_v35 }
 0x224   :  { %v3416_v46 = vpop.eup %3415  ;;  %2746 = vst [vmem:[%s4455_s3 + $0x60] sm:$0xff] %v2426_v58  ;;  %v2427_v3 = vmul.f32 %v3414_v17, %v4469_v21 }
 0x225   :  { %v3418_v4 = vpop.eup %3417  ;;  %2445 = vst [vmem:[%s4455_s3 + $0x28] sm:$0xff] %v2425_v52  ;;  %v2428_v1 = vmul.f32 %v3416_v46, %v3398_v25 }
 0x226   :  { %v3420_v47 = vpop.eup %3419  ;;  %2747 = vst [vmem:[%s4455_s3 + $0x68] sm:$0xff] %v2427_v3  ;;  %v2430_v39 = vmul.f32 %v3418_v4, %v3400_v63 }
 0x227   :  { %2446 = vst [vmem:[%s4455_s3 + $0x30] sm:$0xff] %v2428_v1  ;;  %v2429_v19 = vmul.f32 %v3420_v47, %v3402_v29  ;;  %v3422_v14 = vpop.eup %3421 }
 0x228   :  { %2748 = vst [vmem:[%s4455_s3 + $0x70] sm:$0xff] %v2430_v39 }
 0x229   :  { %v3424_v49 = vpop.eup %3423  ;;  %2447 = vst [vmem:[%s4455_s3 + $0x38] sm:$0xff] %v2429_v19 }
 0x22a   :  { %v2431_v12 = vmul.f32 %v3424_v49, %v3422_v14 }
 0x22c   :  { %2749 = vst [vmem:[%s4455_s3 + $0x78] sm:$0xff] %v2431_v12 }

</bundles_post_ra>
